<compile_context>
chip_gen: v7x
topology: tpu7x:2x2x1
jax: 0.10.0
libtpu: 0.0.40
codegen_flags: <defaults>
</compile_context>

<pallas_src>
import jax
import jax.numpy as jnp
import numpy as np
from jax.experimental import pallas as pl
from jax.experimental.pallas import tpu as pltpu


def _pick_tile(n, candidates=(512, 256, 128)):
    """Largest candidate tile that divides n (falls back to n itself)."""
    for c in candidates:
        if n % c == 0:
            return c
    return n


# ---------------------------------------------------------------------------
# Kernel 1: offset-attention + conv_b + trans_conv, tiled over query rows.
# grid = (B, N // row_tile); batch "parallel", row axis "arbitrary" (reduction).
# ---------------------------------------------------------------------------
def qsa_attn_kernel(xf_ref, xrow_ref, wq_ref, wv_ref, bv_ref, wb_ref, bb_ref,
                    wt_ref, bt_ref,
                    t_ref, tsum_ref, tsq_ref,
                    xq_sc, racc_sc, csum_sc):
    r = pl.program_id(1)
    bf16 = jnp.bfloat16

    @pl.when(r == 0)
    def _init():
        # q/k projection of the whole batch element (q_conv.weight is k_conv.weight),
        # kept resident in VMEM in bf16 as the RHS of every energy matmul.
        xq_sc[...] = jnp.dot(wq_ref[...], xf_ref[...].astype(bf16),
                             preferred_element_type=jnp.float32).astype(bf16)
        racc_sc[...] = jnp.zeros_like(racc_sc)
        csum_sc[...] = jnp.zeros_like(csum_sc)

    # This step's query rows (a lane slab of x, DMA'd by BlockSpec).  The tiny
    # per-tile projections are recomputed (O(C^2*TR), hides under EUP/VPU slack)
    # instead of dynamically lane-slicing the resident scratch buffer.
    x_rows = xrow_ref[...].astype(bf16)                                  # (C, TR)
    xq_rows = jnp.dot(wq_ref[...], x_rows,
                      preferred_element_type=jnp.float32)                # (C//4, TR)
    xv_rows = jnp.dot(wv_ref[...], x_rows,
                      preferred_element_type=jnp.float32) + bv_ref[...]  # (C, TR)

    # energy rows: E[n, m] = <q_n, q_m>, contracting over the C//4 axis.
    # lhs contracts dim 0 (MXU transposed-lhs path) -> (TR, N) f32 accumulation.
    e = jax.lax.dot_general(xq_rows.astype(bf16), xq_sc[...],
                            (((0,), (0,)), ((), ())),
                            preferred_element_type=jnp.float32)          # (TR, N)

    # Exact row softmax (full rows live in this tile).  Divide -> EUP reciprocal.
    p = jnp.exp(e - jnp.max(e, axis=-1, keepdims=True))
    p = p * pl.reciprocal(jnp.sum(p, axis=-1, keepdims=True), approx=True)

    # Accumulate offset-attention column sums and x_v @ A0 across row tiles.
    csum_sc[...] += jnp.sum(p, axis=0, keepdims=True)                    # (1, N)
    racc_sc[...] += jnp.dot(xv_rows.astype(bf16), p.astype(bf16),
                            preferred_element_type=jnp.float32)          # (C, N)

    @pl.when(r == pl.num_programs(1) - 1)
    def _finalize():
        x = xf_ref[...]                                                  # (C, N)
        xb = x.astype(bf16)
        xv = jnp.dot(wv_ref[...], xb,
                     preferred_element_type=jnp.float32) + bv_ref[...]   # (C, N)
        # x_r = (x_v @ A0) / (1e-9 + column sums)   (second normalization)
        x_r = racc_sc[...] * pl.reciprocal(1e-9 + csum_sc[...], approx=True)
        cb = jnp.dot(wb_ref[...], (x * x).astype(bf16),
                     preferred_element_type=jnp.float32) + bb_ref[...]
        x_r = x_r + cb * xv
        t = jnp.dot(wt_ref[...], (x - x_r).astype(bf16),
                    preferred_element_type=jnp.float32) + bt_ref[...]
        t_ref[...] = t
        # BatchNorm partials per batch element, reduced for free while t is in VMEM.
        tsum_ref[...] = jnp.sum(t, axis=1, keepdims=True)
        tsq_ref[...] = jnp.sum(t * t, axis=1, keepdims=True)


# ---------------------------------------------------------------------------
# Kernel 2: BatchNorm apply (global batch stats) + ReLU + residual.  Mem-bound.
# ---------------------------------------------------------------------------
def qsa_bn_kernel(x_ref, t_ref, scale_ref, shift_ref, o_ref):
    y = t_ref[...] * scale_ref[...] + shift_ref[...]
    o_ref[...] = x_ref[...] + jnp.maximum(y, 0.0)


def qsa_layer(x, params, *, row_tile=None):
    """x: (B, C, N) float32 -- same NCL layout as the PyTorch module."""
    B, C, N = x.shape
    Cq = C // 4
    if row_tile is None or N % row_tile != 0:
        row_tile = _pick_tile(N)
    nrow = N // row_tile

    f32, bf16 = jnp.float32, jnp.bfloat16
    x = x.astype(f32)
    # MXU operands in bf16 (f32 accumulation in-kernel); biases stay f32 as
    # (C, 1) columns broadcasting along the lane (N) dimension.  No transposes.
    wq = params['wq'].astype(bf16)            # (C//4, C)  shared q/k weight
    wv = params['wv'].astype(bf16)            # (C, C)
    wb = params['wb'].astype(bf16)            # (C, C)
    wt = params['wt'].astype(bf16)            # (C, C)
    bv = params['bv'].reshape(C, 1).astype(f32)
    bb = params['bb'].reshape(C, 1).astype(f32)
    bt = params['bt'].reshape(C, 1).astype(f32)

    # Advisory cost estimate: attention terms are O((C + C/4) * N^2) MXU flops,
    # exp count is O(N^2) on the EUP; HBM traffic is O(C*N) per batch element.
    flops = int(B * (2 * (Cq + C) * N * N + 2 * (2 * Cq * C + 4 * C * C) * N))
    transcendentals = int(B * (N * N + 2 * N))
    bytes_accessed = int(B * C * N * 4 * 3 + (Cq * C + 3 * C * C) * 2 + 3 * C * 4)

    const = lambda b, r: (0, 0)
    t, tsum, tsq = pl.pallas_call(
        qsa_attn_kernel,
        grid=(B, nrow),
        in_specs=[
            pl.BlockSpec((None, C, N), lambda b, r: (b, 0, 0)),           # x (full)
            pl.BlockSpec((None, C, row_tile), lambda b, r: (b, 0, r)),    # x (row tile)
            pl.BlockSpec((Cq, C), const),                                 # wq (=wk)
            pl.BlockSpec((C, C), const),                                  # wv
            pl.BlockSpec((C, 1), const),                                  # bv
            pl.BlockSpec((C, C), const),                                  # wb
            pl.BlockSpec((C, 1), const),                                  # bb
            pl.BlockSpec((C, C), const),                                  # wt
            pl.BlockSpec((C, 1), const),                                  # bt
        ],
        out_specs=[
            pl.BlockSpec((None, C, N), lambda b, r: (b, 0, 0)),
            pl.BlockSpec((None, C, 1), lambda b, r: (b, 0, 0)),
            pl.BlockSpec((None, C, 1), lambda b, r: (b, 0, 0)),
        ],
        out_shape=[
            jax.ShapeDtypeStruct((B, C, N), f32),     # t = trans_conv(x - x_r)
            jax.ShapeDtypeStruct((B, C, 1), f32),     # per-batch sum_n t
            jax.ShapeDtypeStruct((B, C, 1), f32),     # per-batch sum_n t^2
        ],
        scratch_shapes=[
            pltpu.VMEM((Cq, N), bf16),                # x_q for current batch element
            pltpu.VMEM((C, N), f32),                  # x_v @ A0 accumulator
            pltpu.VMEM((1, N), f32),                  # attention column-sum accumulator
        ],
        compiler_params=pltpu.CompilerParams(
            dimension_semantics=("parallel", "arbitrary"),
            vmem_limit_bytes=48 * 1024 * 1024),
        cost_estimate=pl.CostEstimate(flops=flops,
                                      transcendentals=transcendentals,
                                      bytes_accessed=bytes_accessed),
    )(x, x, wq, wv, bv, wb, bb, wt, bt)

    # Global training-mode BatchNorm1d statistics over (B, N) per channel,
    # combined from the per-batch partial sums (tiny reduction).
    # TODO(synk): running_mean/running_var buffer updates (module side effect)
    # are not emitted; only the forward normalization is reproduced.
    inv_cnt = 1.0 / float(B * N)
    mean = jnp.sum(tsum, axis=0) * inv_cnt                                # (C, 1)
    var = jnp.maximum(jnp.sum(tsq, axis=0) * inv_cnt - mean * mean, 0.0)  # (C, 1)
    scale = params['gamma'].reshape(C, 1) * jax.lax.rsqrt(var + 1e-5)
    shift = params['beta'].reshape(C, 1) - mean * scale

    col_tile = _pick_tile(N, (2048, 1024, 512, 256, 128))
    out = pl.pallas_call(
        qsa_bn_kernel,
        grid=(B, N // col_tile),
        in_specs=[
            pl.BlockSpec((None, C, col_tile), lambda b, j: (b, 0, j)),
            pl.BlockSpec((None, C, col_tile), lambda b, j: (b, 0, j)),
            pl.BlockSpec((C, 1), lambda b, j: (0, 0)),
            pl.BlockSpec((C, 1), lambda b, j: (0, 0)),
        ],
        out_specs=pl.BlockSpec((None, C, col_tile), lambda b, j: (b, 0, j)),
        out_shape=jax.ShapeDtypeStruct((B, C, N), f32),
        compiler_params=pltpu.CompilerParams(
            dimension_semantics=("parallel", "parallel")),
    )(x, t, scale, shift)
    return out


def qsa_reference(x, p):
    """Pure-JAX f32 reference in PyTorch NCL layout, for correctness checking."""
    xq = jnp.einsum('qc,bcn->bnq', p['wq'], x)           # q_conv(x).permute(0,2,1)
    xk = jnp.einsum('qc,bcn->bqn', p['wq'], x)           # k_conv(x) (shared weight)
    energy = jnp.einsum('bnq,bqm->bnm', xq, xk)
    attention = jax.nn.softmax(energy, axis=-1)
    attention = attention / (1e-9 + jnp.sum(attention, axis=1, keepdims=True))
    xv = jnp.einsum('dc,bcn->bdn', p['wv'], x) + p['bv'][None, :, None]
    xr = jnp.einsum('bdn,bnm->bdm', xv, attention)
    cb = jnp.einsum('dc,bcn->bdn', p['wb'], x * x) + p['bb'][None, :, None]
    xr = xr + cb * xv
    t = jnp.einsum('dc,bcn->bdn', p['wt'], x - xr) + p['bt'][None, :, None]
    mean = jnp.mean(t, axis=(0, 2), keepdims=True)
    var = jnp.mean(jnp.square(t - mean), axis=(0, 2), keepdims=True)
    y = (t - mean) * jax.lax.rsqrt(var + 1e-5) * p['gamma'][None, :, None] \
        + p['beta'][None, :, None]
    return x + jnp.maximum(y, 0.0)


def init_params(key, C):
    ks = jax.random.split(key, 5)
    s = 0.1
    return dict(
        wq=s * jax.random.normal(ks[0], (C // 4, C), jnp.float32),  # shared q/k weight
        wv=s * jax.random.normal(ks[1], (C, C), jnp.float32),
        bv=s * jax.random.normal(ks[2], (C,), jnp.float32),
        wb=jnp.zeros((C, C), jnp.float32),   # conv_b.weight.data.fill_(0)
        bb=jnp.ones((C,), jnp.float32),      # conv_b.bias.data.fill_(1)
        wt=s * jax.random.normal(ks[3], (C, C), jnp.float32),
        bt=s * jax.random.normal(ks[4], (C,), jnp.float32),
        gamma=jnp.ones((C,), jnp.float32),   # BatchNorm1d default affine
        beta=jnp.zeros((C,), jnp.float32),
    )


if __name__ == "__main__":
    key = jax.random.PRNGKey(0)
    B, C, N = 2, 32, 256            # small; row_tile=128 exercises 2 accumulation steps
    kx, kp = jax.random.split(key)
    x = jax.random.normal(kx, (B, C, N), jnp.float32)
    params = init_params(kp, C)

    fn = jax.jit(lambda xx, pp: qsa_layer(xx, pp, row_tile=128))
    out = jax.block_until_ready(fn(x, params))

    ref = qsa_reference(x, params)
    np.testing.assert_allclose(np.asarray(out), np.asarray(ref), rtol=3e-2, atol=3e-2)
    assert out.shape == (B, C, N)
    print("KERNEL_OK")
</pallas_src>

<mosaic_0001>
module attributes {stable_mosaic.version = 11 : i64} {
  func.func @qsa_attn_kernel(%arg0: i32, %arg1: i32, %arg2: memref<1x32x256xf32, #tpu.memory_space<vmem>>, %arg3: memref<1x32x128xf32, #tpu.memory_space<vmem>>, %arg4: memref<8x32xbf16, #tpu.memory_space<vmem>>, %arg5: memref<32x32xbf16, #tpu.memory_space<vmem>>, %arg6: memref<32x1xf32, #tpu.memory_space<vmem>>, %arg7: memref<32x32xbf16, #tpu.memory_space<vmem>>, %arg8: memref<32x1xf32, #tpu.memory_space<vmem>>, %arg9: memref<32x32xbf16, #tpu.memory_space<vmem>>, %arg10: memref<32x1xf32, #tpu.memory_space<vmem>>, %arg11: memref<1x32x256xf32, #tpu.memory_space<vmem>>, %arg12: memref<1x32x1xf32, #tpu.memory_space<vmem>>, %arg13: memref<1x32x1xf32, #tpu.memory_space<vmem>>, %arg14: memref<8x256xbf16, #tpu.memory_space<vmem>>, %arg15: memref<32x256xf32, #tpu.memory_space<vmem>>, %arg16: memref<1x256xf32, #tpu.memory_space<vmem>>) attributes {dimension_semantics = [#tpu.dimension_semantics<parallel>, #tpu.dimension_semantics<arbitrary>], iteration_bounds = array<i64: 2, 2>, scalar_prefetch = 0 : i64, scratch_operands = 3 : i64, tpu.core_type = #tpu.core_type<tc>, window_params = [{transform_indices = @transform_0, window_bounds = array<i64: 1, 32, 256>}, {transform_indices = @transform_1, window_bounds = array<i64: 1, 32, 128>}, {pipeline_mode = #tpu.pipeline_mode<synchronous>, transform_indices = @transform_2, window_bounds = array<i64: 8, 32>}, {pipeline_mode = #tpu.pipeline_mode<synchronous>, transform_indices = @transform_3, window_bounds = array<i64: 32, 32>}, {pipeline_mode = #tpu.pipeline_mode<synchronous>, transform_indices = @transform_4, window_bounds = array<i64: 32, 1>}, {pipeline_mode = #tpu.pipeline_mode<synchronous>, transform_indices = @transform_5, window_bounds = array<i64: 32, 32>}, {pipeline_mode = #tpu.pipeline_mode<synchronous>, transform_indices = @transform_6, window_bounds = array<i64: 32, 1>}, {pipeline_mode = #tpu.pipeline_mode<synchronous>, transform_indices = @transform_7, window_bounds = array<i64: 32, 32>}, {pipeline_mode = #tpu.pipeline_mode<synchronous>, transform_indices = @transform_8, window_bounds = array<i64: 32, 1>}, {transform_indices = @transform_9, window_bounds = array<i64: 1, 32, 256>}, {transform_indices = @transform_10, window_bounds = array<i64: 1, 32, 1>}, {transform_indices = @transform_11, window_bounds = array<i64: 1, 32, 1>}]} {
    %c0_i32 = arith.constant 0 : i32
    %0 = arith.cmpi eq, %arg1, %c0_i32 : i32
    %1 = arith.extui %0 : i1 to i32
    %c0_i32_0 = arith.constant 0 : i32
    %2 = arith.cmpi ne, %1, %c0_i32_0 : i32
    scf.if %2 {
      %c0_26 = arith.constant 0 : index
      %c0_27 = arith.constant 0 : index
      %40 = vector.load %arg4[%c0_26, %c0_27] : memref<8x32xbf16, #tpu.memory_space<vmem>>, vector<8x32xbf16>
      %c0_28 = arith.constant 0 : index
      %c0_29 = arith.constant 0 : index
      %c0_30 = arith.constant 0 : index
      %41 = vector.load %arg2[%c0_28, %c0_29, %c0_30] : memref<1x32x256xf32, #tpu.memory_space<vmem>>, vector<1x32x256xf32>
      %42 = vector.shape_cast %41 : vector<1x32x256xf32> to vector<32x256xf32>
      %43 = arith.truncf %42 : vector<32x256xf32> to vector<32x256xbf16>
      %cst_31 = arith.constant dense<0.000000e+00> : vector<8x256xf32>
      %44 = tpu.matmul %40, %43, %cst_31 {dimension_numbers = #tpu.dot_dimension_numbers<[1], [0], [0], [1], [0, 0, 1, 1], [], []>} : vector<8x32xbf16>, vector<32x256xbf16>, vector<8x256xf32> -> vector<8x256xf32>
      %45 = arith.truncf %44 : vector<8x256xf32> to vector<8x256xbf16>
      %c0_32 = arith.constant 0 : index
      %c0_33 = arith.constant 0 : index
      %46 = vector.load %arg14[%c0_32, %c0_33] : memref<8x256xbf16, #tpu.memory_space<vmem>>, vector<8x256xbf16>
      tpu.vector_store %arg14[%c0_32, %c0_33], %45 {strides = array<i32>} : memref<8x256xbf16, #tpu.memory_space<vmem>>, vector<8x256xbf16>,
      %cst_34 = arith.constant 0.000000e+00 : f32
      %47 = vector.broadcast %cst_34 : f32 to vector<32x256xf32>
      %c0_35 = arith.constant 0 : index
      %c0_36 = arith.constant 0 : index
      %48 = vector.load %arg15[%c0_35, %c0_36] : memref<32x256xf32, #tpu.memory_space<vmem>>, vector<32x256xf32>
      tpu.vector_store %arg15[%c0_35, %c0_36], %47 {strides = array<i32>} : memref<32x256xf32, #tpu.memory_space<vmem>>, vector<32x256xf32>,
      %cst_37 = arith.constant 0.000000e+00 : f32
      %49 = vector.broadcast %cst_37 : f32 to vector<1x256xf32>
      %c0_38 = arith.constant 0 : index
      %c0_39 = arith.constant 0 : index
      %50 = vector.load %arg16[%c0_38, %c0_39] : memref<1x256xf32, #tpu.memory_space<vmem>>, vector<1x256xf32>
      tpu.vector_store %arg16[%c0_38, %c0_39], %49 {strides = array<i32>} : memref<1x256xf32, #tpu.memory_space<vmem>>, vector<1x256xf32>,
    } else {
    }
    %c0 = arith.constant 0 : index
    %c0_1 = arith.constant 0 : index
    %c0_2 = arith.constant 0 : index
    %3 = vector.load %arg3[%c0, %c0_1, %c0_2] : memref<1x32x128xf32, #tpu.memory_space<vmem>>, vector<1x32x128xf32>
    %4 = vector.shape_cast %3 : vector<1x32x128xf32> to vector<32x128xf32>
    %5 = arith.truncf %4 : vector<32x128xf32> to vector<32x128xbf16>
    %c0_3 = arith.constant 0 : index
    %c0_4 = arith.constant 0 : index
    %6 = vector.load %arg4[%c0_3, %c0_4] : memref<8x32xbf16, #tpu.memory_space<vmem>>, vector<8x32xbf16>
    %cst = arith.constant dense<0.000000e+00> : vector<8x128xf32>
    %7 = tpu.matmul %6, %5, %cst {dimension_numbers = #tpu.dot_dimension_numbers<[1], [0], [0], [1], [0, 0, 1, 1], [], []>} : vector<8x32xbf16>, vector<32x128xbf16>, vector<8x128xf32> -> vector<8x128xf32>
    %c0_5 = arith.constant 0 : index
    %c0_6 = arith.constant 0 : index
    %8 = vector.load %arg5[%c0_5, %c0_6] : memref<32x32xbf16, #tpu.memory_space<vmem>>, vector<32x32xbf16>
    %cst_7 = arith.constant dense<0.000000e+00> : vector<32x128xf32>
    %9 = tpu.matmul %8, %5, %cst_7 {dimension_numbers = #tpu.dot_dimension_numbers<[1], [0], [0], [1], [0, 0, 1, 1], [], []>} : vector<32x32xbf16>, vector<32x128xbf16>, vector<32x128xf32> -> vector<32x128xf32>
    %c0_8 = arith.constant 0 : index
    %c0_9 = arith.constant 0 : index
    %10 = vector.load %arg6[%c0_8, %c0_9] : memref<32x1xf32, #tpu.memory_space<vmem>>, vector<32x1xf32>
    %11 = vector.broadcast %10 : vector<32x1xf32> to vector<32x128xf32>
    %12 = arith.addf %9, %11 : vector<32x128xf32>
    %13 = arith.truncf %7 : vector<8x128xf32> to vector<8x128xbf16>
    %c0_10 = arith.constant 0 : index
    %c0_11 = arith.constant 0 : index
    %14 = vector.load %arg14[%c0_10, %c0_11] : memref<8x256xbf16, #tpu.memory_space<vmem>>, vector<8x256xbf16>
    %cst_12 = arith.constant dense<0.000000e+00> : vector<128x256xf32>
    %15 = tpu.matmul %13, %14, %cst_12 {dimension_numbers = #tpu.dot_dimension_numbers<[0], [0], [1], [1], [0, 1, 1, 1], [], []>} : vector<8x128xbf16>, vector<8x256xbf16>, vector<128x256xf32> -> vector<128x256xf32>
    %cst_13 = arith.constant dense<0xFF800000> : vector<128xf32>
    %16 = vector.multi_reduction <maximumf>, %15, %cst_13 [1] : vector<128x256xf32> to vector<128xf32>
    %17 = vector.shape_cast %16 : vector<128xf32> to vector<128x1xf32>
    %18 = vector.broadcast %17 : vector<128x1xf32> to vector<128x256xf32>
    %19 = arith.subf %15, %18 : vector<128x256xf32>
    %20 = math.exp %19 : vector<128x256xf32>
    %cst_14 = arith.constant dense<0.000000e+00> : vector<128xf32>
    %21 = vector.multi_reduction <add>, %20, %cst_14 [1] : vector<128x256xf32> to vector<128xf32>
    %22 = vector.shape_cast %21 : vector<128xf32> to vector<128x1xf32>
    %23 = tpu.reciprocal %22 {approx = true} : vector<128x1xf32> -> vector<128x1xf32>
    %24 = vector.broadcast %23 : vector<128x1xf32> to vector<128x256xf32>
    %25 = arith.mulf %20, %24 : vector<128x256xf32>
    %c0_15 = arith.constant 0 : index
    %c0_16 = arith.constant 0 : index
    %26 = vector.load %arg16[%c0_15, %c0_16] : memref<1x256xf32, #tpu.memory_space<vmem>>, vector<1x256xf32>
    %cst_17 = arith.constant dense<0.000000e+00> : vector<256xf32>
    %27 = vector.multi_reduction <add>, %25, %cst_17 [0] : vector<128x256xf32> to vector<256xf32>
    %28 = vector.shape_cast %27 : vector<256xf32> to vector<1x256xf32>
    %29 = arith.addf %26, %28 : vector<1x256xf32>
    %c0_18 = arith.constant 0 : index
    %c0_19 = arith.constant 0 : index
    %30 = vector.load %arg16[%c0_18, %c0_19] : memref<1x256xf32, #tpu.memory_space<vmem>>, vector<1x256xf32>
    tpu.vector_store %arg16[%c0_18, %c0_19], %29 {strides = array<i32>} : memref<1x256xf32, #tpu.memory_space<vmem>>, vector<1x256xf32>,
    %c0_20 = arith.constant 0 : index
    %c0_21 = arith.constant 0 : index
    %31 = vector.load %arg15[%c0_20, %c0_21] : memref<32x256xf32, #tpu.memory_space<vmem>>, vector<32x256xf32>
    %32 = arith.truncf %12 : vector<32x128xf32> to vector<32x128xbf16>
    %33 = arith.truncf %25 : vector<128x256xf32> to vector<128x256xbf16>
    %cst_22 = arith.constant dense<0.000000e+00> : vector<32x256xf32>
    %34 = tpu.matmul %32, %33, %cst_22 {dimension_numbers = #tpu.dot_dimension_numbers<[1], [0], [0], [1], [0, 0, 1, 1], [], []>} : vector<32x128xbf16>, vector<128x256xbf16>, vector<32x256xf32> -> vector<32x256xf32>
    %35 = arith.addf %31, %34 : vector<32x256xf32>
    %c0_23 = arith.constant 0 : index
    %c0_24 = arith.constant 0 : index
    %36 = vector.load %arg15[%c0_23, %c0_24] : memref<32x256xf32, #tpu.memory_space<vmem>>, vector<32x256xf32>
    tpu.vector_store %arg15[%c0_23, %c0_24], %35 {strides = array<i32>} : memref<32x256xf32, #tpu.memory_space<vmem>>, vector<32x256xf32>,
    %c1_i32 = arith.constant 1 : i32
    %37 = arith.cmpi eq, %arg1, %c1_i32 : i32
    %38 = arith.extui %37 : i1 to i32
    %c0_i32_25 = arith.constant 0 : i32
    %39 = arith.cmpi ne, %38, %c0_i32_25 : i32
    scf.if %39 {
      %c0_26 = arith.constant 0 : index
      %c0_27 = arith.constant 0 : index
      %c0_28 = arith.constant 0 : index
      %40 = vector.load %arg2[%c0_26, %c0_27, %c0_28] : memref<1x32x256xf32, #tpu.memory_space<vmem>>, vector<1x32x256xf32>
      %41 = vector.shape_cast %40 : vector<1x32x256xf32> to vector<32x256xf32>
      %42 = arith.truncf %41 : vector<32x256xf32> to vector<32x256xbf16>
      %c0_29 = arith.constant 0 : index
      %c0_30 = arith.constant 0 : index
      %43 = vector.load %arg5[%c0_29, %c0_30] : memref<32x32xbf16, #tpu.memory_space<vmem>>, vector<32x32xbf16>
      %cst_31 = arith.constant dense<0.000000e+00> : vector<32x256xf32>
      %44 = tpu.matmul %43, %42, %cst_31 {dimension_numbers = #tpu.dot_dimension_numbers<[1], [0], [0], [1], [0, 0, 1, 1], [], []>} : vector<32x32xbf16>, vector<32x256xbf16>, vector<32x256xf32> -> vector<32x256xf32>
      %c0_32 = arith.constant 0 : index
      %c0_33 = arith.constant 0 : index
      %45 = vector.load %arg6[%c0_32, %c0_33] : memref<32x1xf32, #tpu.memory_space<vmem>>, vector<32x1xf32>
      %46 = vector.broadcast %45 : vector<32x1xf32> to vector<32x256xf32>
      %47 = arith.addf %44, %46 : vector<32x256xf32>
      %c0_34 = arith.constant 0 : index
      %c0_35 = arith.constant 0 : index
      %48 = vector.load %arg15[%c0_34, %c0_35] : memref<32x256xf32, #tpu.memory_space<vmem>>, vector<32x256xf32>
      %c0_36 = arith.constant 0 : index
      %c0_37 = arith.constant 0 : index
      %49 = vector.load %arg16[%c0_36, %c0_37] : memref<1x256xf32, #tpu.memory_space<vmem>>, vector<1x256xf32>
      %cst_38 = arith.constant 9.99999971E-10 : f32
      %50 = vector.broadcast %cst_38 : f32 to vector<1x256xf32>
      %51 = arith.addf %50, %49 : vector<1x256xf32>
      %52 = tpu.reciprocal %51 {approx = true} : vector<1x256xf32> -> vector<1x256xf32>
      %53 = vector.broadcast %52 : vector<1x256xf32> to vector<32x256xf32>
      %54 = arith.mulf %48, %53 : vector<32x256xf32>
      %c0_39 = arith.constant 0 : index
      %c0_40 = arith.constant 0 : index
      %55 = vector.load %arg7[%c0_39, %c0_40] : memref<32x32xbf16, #tpu.memory_space<vmem>>, vector<32x32xbf16>
      %56 = arith.mulf %41, %41 : vector<32x256xf32>
      %57 = arith.truncf %56 : vector<32x256xf32> to vector<32x256xbf16>
      %cst_41 = arith.constant dense<0.000000e+00> : vector<32x256xf32>
      %58 = tpu.matmul %55, %57, %cst_41 {dimension_numbers = #tpu.dot_dimension_numbers<[1], [0], [0], [1], [0, 0, 1, 1], [], []>} : vector<32x32xbf16>, vector<32x256xbf16>, vector<32x256xf32> -> vector<32x256xf32>
      %c0_42 = arith.constant 0 : index
      %c0_43 = arith.constant 0 : index
      %59 = vector.load %arg8[%c0_42, %c0_43] : memref<32x1xf32, #tpu.memory_space<vmem>>, vector<32x1xf32>
      %60 = vector.broadcast %59 : vector<32x1xf32> to vector<32x256xf32>
      %61 = arith.addf %58, %60 : vector<32x256xf32>
      %62 = arith.mulf %61, %47 : vector<32x256xf32>
      %63 = arith.addf %54, %62 : vector<32x256xf32>
      %c0_44 = arith.constant 0 : index
      %c0_45 = arith.constant 0 : index
      %64 = vector.load %arg9[%c0_44, %c0_45] : memref<32x32xbf16, #tpu.memory_space<vmem>>, vector<32x32xbf16>
      %65 = arith.subf %41, %63 : vector<32x256xf32>
      %66 = arith.truncf %65 : vector<32x256xf32> to vector<32x256xbf16>
      %cst_46 = arith.constant dense<0.000000e+00> : vector<32x256xf32>
      %67 = tpu.matmul %64, %66, %cst_46 {dimension_numbers = #tpu.dot_dimension_numbers<[1], [0], [0], [1], [0, 0, 1, 1], [], []>} : vector<32x32xbf16>, vector<32x256xbf16>, vector<32x256xf32> -> vector<32x256xf32>
      %c0_47 = arith.constant 0 : index
      %c0_48 = arith.constant 0 : index
      %68 = vector.load %arg10[%c0_47, %c0_48] : memref<32x1xf32, #tpu.memory_space<vmem>>, vector<32x1xf32>
      %69 = vector.broadcast %68 : vector<32x1xf32> to vector<32x256xf32>
      %70 = arith.addf %67, %69 : vector<32x256xf32>
      %c0_49 = arith.constant 0 : index
      %c0_50 = arith.constant 0 : index
      %c0_51 = arith.constant 0 : index
      %71 = vector.load %arg11[%c0_49, %c0_50, %c0_51] : memref<1x32x256xf32, #tpu.memory_space<vmem>>, vector<1x32x256xf32>
      %72 = vector.shape_cast %71 : vector<1x32x256xf32> to vector<32x256xf32>
      %73 = vector.shape_cast %70 : vector<32x256xf32> to vector<1x32x256xf32>
      tpu.vector_store %arg11[%c0_49, %c0_50, %c0_51], %73 {strides = array<i32>} : memref<1x32x256xf32, #tpu.memory_space<vmem>>, vector<1x32x256xf32>,
      %cst_52 = arith.constant dense<0.000000e+00> : vector<32xf32>
      %74 = vector.multi_reduction <add>, %70, %cst_52 [1] : vector<32x256xf32> to vector<32xf32>
      %75 = vector.shape_cast %74 : vector<32xf32> to vector<32x1xf32>
      %c0_53 = arith.constant 0 : index
      %c0_54 = arith.constant 0 : index
      %c0_55 = arith.constant 0 : index
      %76 = vector.load %arg12[%c0_53, %c0_54, %c0_55] : memref<1x32x1xf32, #tpu.memory_space<vmem>>, vector<1x32x1xf32>
      %77 = vector.shape_cast %76 : vector<1x32x1xf32> to vector<32x1xf32>
      %78 = vector.shape_cast %75 : vector<32x1xf32> to vector<1x32x1xf32>
      tpu.vector_store %arg12[%c0_53, %c0_54, %c0_55], %78 {strides = array<i32>} : memref<1x32x1xf32, #tpu.memory_space<vmem>>, vector<1x32x1xf32>,
      %79 = arith.mulf %70, %70 : vector<32x256xf32>
      %cst_56 = arith.constant dense<0.000000e+00> : vector<32xf32>
      %80 = vector.multi_reduction <add>, %79, %cst_56 [1] : vector<32x256xf32> to vector<32xf32>
      %81 = vector.shape_cast %80 : vector<32xf32> to vector<32x1xf32>
      %c0_57 = arith.constant 0 : index
      %c0_58 = arith.constant 0 : index
      %c0_59 = arith.constant 0 : index
      %82 = vector.load %arg13[%c0_57, %c0_58, %c0_59] : memref<1x32x1xf32, #tpu.memory_space<vmem>>, vector<1x32x1xf32>
      %83 = vector.shape_cast %82 : vector<1x32x1xf32> to vector<32x1xf32>
      %84 = vector.shape_cast %81 : vector<32x1xf32> to vector<1x32x1xf32>
      tpu.vector_store %arg13[%c0_57, %c0_58, %c0_59], %84 {strides = array<i32>} : memref<1x32x1xf32, #tpu.memory_space<vmem>>, vector<1x32x1xf32>,
    } else {
    }
    return
  }
  func.func @transform_0(%arg0: i32, %arg1: i32) -> (i32, i32, i32) {
    %c0_i32 = arith.constant 0 : i32
    %c0_i32_0 = arith.constant 0 : i32
    %c0_i32_1 = arith.constant 0 : i32
    return %arg0, %c0_i32, %c0_i32_0 : i32, i32, i32
  }
  func.func @transform_1(%arg0: i32, %arg1: i32) -> (i32, i32, i32) {
    %c0_i32 = arith.constant 0 : i32
    %c0_i32_0 = arith.constant 0 : i32
    return %arg0, %c0_i32, %arg1 : i32, i32, i32
  }
  func.func @transform_2(%arg0: i32, %arg1: i32) -> (i32, i32) {
    %c0_i32 = arith.constant 0 : i32
    %c0_i32_0 = arith.constant 0 : i32
    %c0_i32_1 = arith.constant 0 : i32
    return %c0_i32, %c0_i32_0 : i32, i32
  }
  func.func @transform_3(%arg0: i32, %arg1: i32) -> (i32, i32) {
    %c0_i32 = arith.constant 0 : i32
    %c0_i32_0 = arith.constant 0 : i32
    %c0_i32_1 = arith.constant 0 : i32
    return %c0_i32, %c0_i32_0 : i32, i32
  }
  func.func @transform_4(%arg0: i32, %arg1: i32) -> (i32, i32) {
    %c0_i32 = arith.constant 0 : i32
    %c0_i32_0 = arith.constant 0 : i32
    %c0_i32_1 = arith.constant 0 : i32
    return %c0_i32, %c0_i32_0 : i32, i32
  }
  func.func @transform_5(%arg0: i32, %arg1: i32) -> (i32, i32) {
    %c0_i32 = arith.constant 0 : i32
    %c0_i32_0 = arith.constant 0 : i32
    %c0_i32_1 = arith.constant 0 : i32
    return %c0_i32, %c0_i32_0 : i32, i32
  }
  func.func @transform_6(%arg0: i32, %arg1: i32) -> (i32, i32) {
    %c0_i32 = arith.constant 0 : i32
    %c0_i32_0 = arith.constant 0 : i32
    %c0_i32_1 = arith.constant 0 : i32
    return %c0_i32, %c0_i32_0 : i32, i32
  }
  func.func @transform_7(%arg0: i32, %arg1: i32) -> (i32, i32) {
    %c0_i32 = arith.constant 0 : i32
    %c0_i32_0 = arith.constant 0 : i32
    %c0_i32_1 = arith.constant 0 : i32
    return %c0_i32, %c0_i32_0 : i32, i32
  }
  func.func @transform_8(%arg0: i32, %arg1: i32) -> (i32, i32) {
    %c0_i32 = arith.constant 0 : i32
    %c0_i32_0 = arith.constant 0 : i32
    %c0_i32_1 = arith.constant 0 : i32
    return %c0_i32, %c0_i32_0 : i32, i32
  }
  func.func @transform_9(%arg0: i32, %arg1: i32) -> (i32, i32, i32) {
    %c0_i32 = arith.constant 0 : i32
    %c0_i32_0 = arith.constant 0 : i32
    %c0_i32_1 = arith.constant 0 : i32
    return %arg0, %c0_i32, %c0_i32_0 : i32, i32, i32
  }
  func.func @transform_10(%arg0: i32, %arg1: i32) -> (i32, i32, i32) {
    %c0_i32 = arith.constant 0 : i32
    %c0_i32_0 = arith.constant 0 : i32
    %c0_i32_1 = arith.constant 0 : i32
    return %arg0, %c0_i32, %c0_i32_0 : i32, i32, i32
  }
  func.func @transform_11(%arg0: i32, %arg1: i32) -> (i32, i32, i32) {
    %c0_i32 = arith.constant 0 : i32
    %c0_i32_0 = arith.constant 0 : i32
    %c0_i32_1 = arith.constant 0 : i32
    return %arg0, %c0_i32, %c0_i32_0 : i32, i32, i32
  }
}

module attributes {stable_mosaic.version = 11 : i64} {
  func.func @qsa_bn_kernel(%arg0: i32, %arg1: i32, %arg2: memref<1x32x256xf32, #tpu.memory_space<vmem>>, %arg3: memref<1x32x256xf32, #tpu.memory_space<vmem>>, %arg4: memref<32x1xf32, #tpu.memory_space<vmem>>, %arg5: memref<32x1xf32, #tpu.memory_space<vmem>>, %arg6: memref<1x32x256xf32, #tpu.memory_space<vmem>>) attributes {dimension_semantics = [#tpu.dimension_semantics<parallel>, #tpu.dimension_semantics<parallel>], iteration_bounds = array<i64: 2, 1>, scalar_prefetch = 0 : i64, scratch_operands = 0 : i64, tpu.core_type = #tpu.core_type<tc>, window_params = [{transform_indices = @transform_0, window_bounds = array<i64: 1, 32, 256>}, {transform_indices = @transform_1, window_bounds = array<i64: 1, 32, 256>}, {pipeline_mode = #tpu.pipeline_mode<synchronous>, transform_indices = @transform_2, window_bounds = array<i64: 32, 1>}, {pipeline_mode = #tpu.pipeline_mode<synchronous>, transform_indices = @transform_3, window_bounds = array<i64: 32, 1>}, {transform_indices = @transform_4, window_bounds = array<i64: 1, 32, 256>}]} {
    %c0 = arith.constant 0 : index
    %c0_0 = arith.constant 0 : index
    %c0_1 = arith.constant 0 : index
    %0 = vector.load %arg3[%c0, %c0_0, %c0_1] : memref<1x32x256xf32, #tpu.memory_space<vmem>>, vector<1x32x256xf32>
    %1 = vector.shape_cast %0 : vector<1x32x256xf32> to vector<32x256xf32>
    %c0_2 = arith.constant 0 : index
    %c0_3 = arith.constant 0 : index
    %2 = vector.load %arg4[%c0_2, %c0_3] : memref<32x1xf32, #tpu.memory_space<vmem>>, vector<32x1xf32>
    %3 = vector.broadcast %2 : vector<32x1xf32> to vector<32x256xf32>
    %4 = arith.mulf %1, %3 : vector<32x256xf32>
    %c0_4 = arith.constant 0 : index
    %c0_5 = arith.constant 0 : index
    %5 = vector.load %arg5[%c0_4, %c0_5] : memref<32x1xf32, #tpu.memory_space<vmem>>, vector<32x1xf32>
    %6 = vector.broadcast %5 : vector<32x1xf32> to vector<32x256xf32>
    %7 = arith.addf %4, %6 : vector<32x256xf32>
    %c0_6 = arith.constant 0 : index
    %c0_7 = arith.constant 0 : index
    %c0_8 = arith.constant 0 : index
    %8 = vector.load %arg2[%c0_6, %c0_7, %c0_8] : memref<1x32x256xf32, #tpu.memory_space<vmem>>, vector<1x32x256xf32>
    %9 = vector.shape_cast %8 : vector<1x32x256xf32> to vector<32x256xf32>
    %cst = arith.constant 0.000000e+00 : f32
    %10 = vector.broadcast %cst : f32 to vector<32x256xf32>
    %11 = arith.maximumf %7, %10 : vector<32x256xf32>
    %12 = arith.addf %9, %11 : vector<32x256xf32>
    %c0_9 = arith.constant 0 : index
    %c0_10 = arith.constant 0 : index
    %c0_11 = arith.constant 0 : index
    %13 = vector.load %arg6[%c0_9, %c0_10, %c0_11] : memref<1x32x256xf32, #tpu.memory_space<vmem>>, vector<1x32x256xf32>
    %14 = vector.shape_cast %13 : vector<1x32x256xf32> to vector<32x256xf32>
    %15 = vector.shape_cast %12 : vector<32x256xf32> to vector<1x32x256xf32>
    tpu.vector_store %arg6[%c0_9, %c0_10, %c0_11], %15 {strides = array<i32>} : memref<1x32x256xf32, #tpu.memory_space<vmem>>, vector<1x32x256xf32>,
    return
  }
  func.func @transform_0(%arg0: i32, %arg1: i32) -> (i32, i32, i32) {
    %c0_i32 = arith.constant 0 : i32
    %c0_i32_0 = arith.constant 0 : i32
    return %arg0, %c0_i32, %arg1 : i32, i32, i32
  }
  func.func @transform_1(%arg0: i32, %arg1: i32) -> (i32, i32, i32) {
    %c0_i32 = arith.constant 0 : i32
    %c0_i32_0 = arith.constant 0 : i32
    return %arg0, %c0_i32, %arg1 : i32, i32, i32
  }
  func.func @transform_2(%arg0: i32, %arg1: i32) -> (i32, i32) {
    %c0_i32 = arith.constant 0 : i32
    %c0_i32_0 = arith.constant 0 : i32
    %c0_i32_1 = arith.constant 0 : i32
    return %c0_i32, %c0_i32_0 : i32, i32
  }
  func.func @transform_3(%arg0: i32, %arg1: i32) -> (i32, i32) {
    %c0_i32 = arith.constant 0 : i32
    %c0_i32_0 = arith.constant 0 : i32
    %c0_i32_1 = arith.constant 0 : i32
    return %c0_i32, %c0_i32_0 : i32, i32
  }
  func.func @transform_4(%arg0: i32, %arg1: i32) -> (i32, i32, i32) {
    %c0_i32 = arith.constant 0 : i32
    %c0_i32_0 = arith.constant 0 : i32
    return %arg0, %c0_i32, %arg1 : i32, i32, i32
  }
}

</mosaic_0001>

<bundles_post_ra>
// kernel: _lambda_.3
= control target key start
LH: loop header
LB: loop body
LE: loop exit
PB: predicated region body
PF: predicated region fallthrough
CT: control target
= control target key end

     0   :  { %9 = vsyncpa [#allocation3], 0  ;;  %s823_s0 = inlined_call_operand.vmem [shape: f32[2,32,256], index: 0, kind: input, shape index: {}]   ;;  %s824_s1 = inlined_call_operand.vmem [shape: f32[2,32,256], index: 1, kind: input, shape index: {}]   ;;  %s825_s2 = inlined_call_operand.vmem [shape: f32[32,1], index: 2, kind: input, shape index: {}]   ;;  %s826_s3 = inlined_call_operand.vmem [shape: f32[32,1], index: 3, kind: input, shape index: {}]   ;;  %s827_s4 = inlined_call_operand.hbm [shape: f32[2,32,256], index: 4, kind: output, shape index: {}]  }
   0x1   :  { %11 = vsyncpa [#allocation3 + $0x1], 0  ;;  %s667_s15 = smov 0   ;;  %s669_s16 = smov 0  }
   0x2   :  { %s671_s17 = smov 0   ;;  %s673_s18 = smov 0  }
   0x3   :  { %s675_s19 = smov 0   ;;  %s677_s20 = smov 0  }
   0x4 LB: > { %s480_s21 = sadd.s32 4294967295, %s636_s20   ;;  %s481_s22 = sadd.s32 4294967294, %s636_s20   ;;  %s636_s20 = sphi %s677_s20, %s17_s20   ;;  %s632_s19 = sphi %s675_s19, %s834_s19   ;;  %s628_s18 = sphi %s673_s18, %s833_s18   ;;  %s624_s17 = sphi %s671_s17, %s832_s17   ;;  %s620_s16 = sphi %s669_s16, %s831_s16   ;;  %s616_s15 = sphi %s667_s15, %s830_s15  }
   0x5   : > { %s29_s23 = sadd.s32 1, %s632_s19  ;;  %s136_s24 = sadd.s32 1, %s624_s17 }
   0x6   : > { %p31_p0 = scmp.ge.s32.totalorder %s29_s23, 2  ;;  %p146_p1 = scmp.ne.s32.totalorder %s624_s17, %s620_s16 }
   0x7   : > { %p147_p2 = scmp.eq.s32.totalorder %s480_s21, 1  ;;  %p152_p3 = scmp.ne.s32.totalorder %s620_s16, %s616_s15 }
   0x8   : > { %s836_s23 = smov (%p31_p0, %s29_s23), 0  ;;  %p153_p5 = scmp.eq.s32.totalorder %s481_s22, 1 }
   0x9   : > { %p707_p4 = por %p147_p2, %p146_p1  ;;  %s131_s26 = ssub.s32 %s632_s19, %s836_s23 }
   0xa   : > { %p484_p6 = scmp.ge.s32.totalorder %s636_s20, 1  ;;  %p134_p7 = scmp.eq.s32.totalorder %s131_s26, 0 }
   0xb   : > { %p714_p8 = por %p153_p5, %p152_p3  ;;  %p203_p9 = scmp.lt.s32.totalorder %s636_s20, 3 }
   0xc   : > { %s720_s28 = scalar_select %p134_p7, %s624_s17, %s136_s24  }
   0xd   : > { %p204_p10 = pnand %p484_p6, %p203_p9 }
   0xe   : > { %v273_v0 = vld [vmem:[%s825_s2 + $0x10] sm:$0xff] (!%p204_p10)  ;;  %v271_v1 = vld [vmem:[%s825_s2] sm:$0xff] (!%p204_p10)  ;;  %v638_v2 = vmov (!%p204_p10), 0   ;;  %v274_v3 = vld [vmem:[%s825_s2 + $0x18] sm:$0xff] (!%p204_p10)  ;;  %p243_p11 = scmp.lt.s32.totalorder (!%p204_p10), %s628_s18, 1  ;;  %s239_s11 = sand.u32 (!%p204_p10), 1, %s620_s16  }
   0xf   : > { %207 = sbr.rel (%p204_p10) target bundleno = 179 (0xb3), region = 36  ;;  %557 = vset.pattern.permute.xlu1 (!%p204_p10), %v638_v2  ;;  %556 = vset.pattern.permute.xlu0 (!%p204_p10), %v638_v2  ;;  %v272_v4 = vld [vmem:[%s825_s2 + $0x8] sm:$0xff] (!%p204_p10)  ;;  %v303_v6 = vld [vmem:[%s826_s3] sm:$0xff] (!%p204_p10)  ;;  %v306_v7 = vld [vmem:[%s826_s3 + $0x18] sm:$0xff] (!%p204_p10)  ;;  %s485_s12 = sshll.u32 (!%p204_p10), %s239_s11, 6 }
  0x10   : > { %287 = vperm.xlu1 (!%p204_p10), %557, %v273_v0   ;;  %277 = vperm.xlu0 (!%p204_p10), %556, %v271_v1   ;;  %v304_v5 = vld [vmem:[%s826_s3 + $0x8] sm:$0xff] (!%p204_p10)  ;;  %v305_v8 = vld [vmem:[%s826_s3 + $0x10] sm:$0xff] (!%p204_p10)  ;;  %s497_s13 = sshll.u32 (!%p204_p10), %s628_s18, 10  ;;  %s241_s14 = scalar_lea.vmem (!%p204_p10), [#allocation2], %s485_s12 }
  0x11   : > { %s383_s21 = sshll.u32 (!%p204_p10), %s241_s14, 4  ;;  %s771_s26 = scalar_lea.hbm (!%p204_p10), %s827_s4, %s497_s13  ;;  %s773_s21 = int_to_ptr.vmem [resolvable:$true] %s383_s21 }
  0x14   : > { %292 = vperm.xlu1 (!%p204_p10), %557, %v274_v3   ;;  %282 = vperm.xlu0 (!%p204_p10), %556, %v272_v4  }
  0x16   : > { %s244_s29 = scalar_select %p243_p11, %s628_s18, 1 }
  0x17   : > { %s777_s18 = scalar_lea.sflag [#allocation3], %s239_s11 }
  0x18   : > { %314 = vperm.xlu1 %557, %v304_v5   ;;  %309 = vperm.xlu0 %556, %v303_v6   ;;  %s495_s30 = sshll.u32 %s244_s29, 6  ;;  %s558_s29 = scalar_lea.vmem %s773_s21, 1024 }
  0x19   : > { %s260_s7 = scalar_lea.vmem %s824_s1, %s495_s30  ;;  %s754_s10 = scalar_lea.vmem %s823_s0, %s495_s30 }
  0x1a   : > { %v263_v11 = vld [vmem:[%s260_s7] sm:$0xff]  ;;  %v264_v12 = vld [vmem:[%s260_s7 + $0x8] sm:$0xff]  ;;  %v265_v15 = vld [vmem:[%s260_s7 + $0x10] sm:$0xff]  ;;  %p559_p12 = scmp.ne.s32.totalorder %s773_s21, %s558_s29  ;;  %s639_s30 = smov [#allocation2]  }
  0x1b   : > { %v266_v16 = vld [vmem:[%s260_s7 + $0x18] sm:$0xff]  ;;  %v267_v21 = vld [vmem:[%s260_s7 + $0x20] sm:$0xff]  ;;  %v268_v22 = vld [vmem:[%s260_s7 + $0x28] sm:$0xff]  ;;  %s562_s5 = sshll.u32 %s639_s30, 4  ;;  %s563_s5 = int_to_ptr.vmem [resolvable:$false] %s562_s5 }
  0x1c   : > { %324 = vperm.xlu1 %557, %v306_v7   ;;  %319 = vperm.xlu0 %556, %v305_v8   ;;  %v269_v25 = vld [vmem:[%s260_s7 + $0x30] sm:$0xff]  ;;  %v270_v26 = vld [vmem:[%s260_s7 + $0x38] sm:$0xff]  ;;  %v335_v33 = vld [vmem:[%s754_s10] sm:$0xff]  ;;  %p560_p13 = pnand %p559_p12, %p707_p4  ;;  %s564_s6 = scalar_lea.vmem %s563_s5, 2048 }
  0x1d   : > { %v337_v29 = vld [vmem:[%s754_s10 + $0x10] sm:$0xff]  ;;  %v338_v32 = vld [vmem:[%s754_s10 + $0x18] sm:$0xff]  ;;  %v336_v34 = vld [vmem:[%s754_s10 + $0x8] sm:$0xff]  ;;  %p565_p1 = scmp.lt.s32.totalorder %s773_s21, %s563_s5  ;;  %p566_p2 = scmp.lt.s32.totalorder %s564_s6, %s558_s29 }
  0x1e   : > { %v341_v51 = vld [vmem:[%s754_s10 + $0x30] sm:$0xff]  ;;  %v342_v54 = vld [vmem:[%s754_s10 + $0x38] sm:$0xff]  ;;  %v339_v55 = vld [vmem:[%s754_s10 + $0x20] sm:$0xff]  ;;  %p561_p0 = pneg %p560_p13 }
  0x1f   : > { %v340_v56 = vld [vmem:[%s754_s10 + $0x28] sm:$0xff]  ;;  %p567_p3 = por %p566_p2, %p565_p1 }
  0x21   : > { %p568_p5 = pnand %p567_p3, %p561_p0 }
  0x8f   : > { %v288_v9 = vpop.permute.xlu1 %287  ;;  %v278_v10 = vpop.permute.xlu0 %277 }
  0x90   : > { %v295_v17 = vmul.f32 %v278_v10, %v263_v11  ;;  %v296_v18 = vmul.f32 %v278_v10, %v264_v12  ;;  %v299_v39 = vmul.f32 %v288_v9, %v267_v21  ;;  %v300_v40 = vmul.f32 %v288_v9, %v268_v22 }
  0x93   : > { %v293_v13 = vpop.permute.xlu1 %292  ;;  %v283_v14 = vpop.permute.xlu0 %282 }
  0x94   : > { %v297_v19 = vmul.f32 %v283_v14, %v265_v15  ;;  %v298_v20 = vmul.f32 %v283_v14, %v266_v16  ;;  %v301_v41 = vmul.f32 %v293_v13, %v269_v25  ;;  %v302_v42 = vmul.f32 %v293_v13, %v270_v26 }
  0x97   : > { %v315_v23 = vpop.permute.xlu1 %314  ;;  %v310_v24 = vpop.permute.xlu0 %309 }
  0x98   : > { %v329_v27 = vadd.f32 %v315_v23, %v297_v19  ;;  %v330_v28 = vadd.f32 %v315_v23, %v298_v20  ;;  %v327_v30 = vadd.f32 %v310_v24, %v295_v17  ;;  %v328_v31 = vadd.f32 %v310_v24, %v296_v18 }
  0x9a   : > { %v345_v35 = vmax.f32 %v329_v27, 0.0  ;;  %v346_v36 = vmax.f32 %v330_v28, 0.0  ;;  %v343_v37 = vmax.f32 %v327_v30, 0.0  ;;  %v344_v38 = vmax.f32 %v328_v31, 0.0 }
  0x9b   : > { %v325_v43 = vpop.permute.xlu1 %324  ;;  %v320_v44 = vpop.permute.xlu0 %319 }
  0x9c   : > { %v353_v45 = vadd.f32 %v345_v35, %v337_v29  ;;  %v354_v46 = vadd.f32 %v346_v36, %v338_v32  ;;  %v351_v47 = vadd.f32 %v343_v37, %v335_v33  ;;  %v352_v48 = vadd.f32 %v344_v38, %v336_v34 }
  0x9d   : > { %v333_v49 = vadd.f32 %v325_v43, %v301_v41  ;;  %v334_v50 = vadd.f32 %v325_v43, %v302_v42  ;;  %v331_v52 = vadd.f32 %v320_v44, %v299_v39  ;;  %v332_v53 = vadd.f32 %v320_v44, %v300_v40 }
  0x9e   : > { %361 = vst [vmem:[%s241_s14 + $0x10] sm:$0xff] %v353_v45  ;;  %362 = vst [vmem:[%s241_s14 + $0x18] sm:$0xff] %v354_v46 }
  0x9f   : > { %359 = vst [vmem:[%s241_s14] sm:$0xff] %v351_v47  ;;  %360 = vst [vmem:[%s241_s14 + $0x8] sm:$0xff] %v352_v48  ;;  %v349_v57 = vmax.f32 %v333_v49, 0.0  ;;  %v350_v58 = vmax.f32 %v334_v50, 0.0  ;;  %v347_v59 = vmax.f32 %v331_v52, 0.0  ;;  %v348_v60 = vmax.f32 %v332_v53, 0.0 }
  0xa1   : > { %v357_v61 = vadd.f32 %v349_v57, %v341_v51  ;;  %v358_v62 = vadd.f32 %v350_v58, %v342_v54  ;;  %v355_v63 = vadd.f32 %v347_v59, %v339_v55  ;;  %v356_v0 = vadd.f32 %v348_v60, %v340_v56 }
  0xa3   : > { %365 = vst [vmem:[%s241_s14 + $0x30] sm:$0xff] %v357_v61  ;;  %366 = vst [vmem:[%s241_s14 + $0x38] sm:$0xff] %v358_v62 }
  0xa4   : > { %363 = vst [vmem:[%s241_s14 + $0x20] sm:$0xff] %v355_v63  ;;  %364 = vst [vmem:[%s241_s14 + $0x28] sm:$0xff] %v356_v0 }
  0xa5   : > { %571 = shalt.err (!%p568_p5)
}
  0xa6   : > { %s572_s7 = scalar_lea.hbm %s771_s26, 1024  ;;  %s576_s10 = scalar_lea.hbm %s827_s4, 2048 }
  0xa7   : > { %p573_p6 = scmp.ne.s32.totalorder %s771_s26, %s572_s7  ;;  %p577_p10 = scmp.lt.u32.totalorder %s771_s26, %s827_s4 }
  0xa8   : > { %p578_p11 = scmp.lt.u32.totalorder %s576_s10, %s572_s7  ;;  %p580_p13 = scmp.lt.u32.totalorder %s572_s7, %s771_s26 }
  0xa9   : > { %p574_p7 = pnand %p573_p6, %p707_p4 }
  0xaa   : > { %p579_p12 = por %p578_p11, %p577_p10 }
  0xab   : > { %p575_p9 = pneg %p574_p7 }
  0xac   : > { %p581_p0 = por %p580_p13, %p579_p12 }
  0xae   : > { %p582_p1 = pnand %p581_p0, %p575_p9 }
  0xb0   : > { %585 = shalt.err (!%p582_p1)
}
  0xb1   : > { %s640_s13 = smov 256   ;;  %s641_s14 = smov 16  }
  0xb2   : > { %498 = dma.vmem_to_hbm [thread:$0]  (%p707_p4), %s773_s21, 1024, %s771_s26, %s777_s18, %s640_s13, %s640_s13, %s641_s14  }
  0xb3 PF: > { %p504_p2 = scmp.ge.s32.totalorder %s636_s20, 2  ;;  %s398_s22 = sand.u32 1, %s616_s15  }
  0xb4   : > { %s399_s24 = scalar_lea.sflag [#allocation3], %s398_s22 }
  0xb5   : > { %p501_p3 = pnand %p504_p2, %p714_p8 }
  0xb7   : > { %611 = dma.done.wait (!%p501_p3), %s399_s24, 1024  }
  0xb8   : > { %613 = vsyncadd (!%p501_p3), %s399_s24, 4294966272  ;;  %s17_s20 = sadd.s32 1, %s636_s20   ;;  %s830_s15 = smov %s620_s16 }
  0xb9   : > { %p14_p5 = scmp.ge.s32.totalorder %s17_s20, 4   ;;  %s831_s16 = smov %s624_s17 }
  0xba   : > { %s832_s17 = smov %s720_s28  ;;  %s833_s18 = smov %s632_s19 }
  0xbb   : > { %s834_s19 = smov %s836_s23  ;;  %16 = sbr.rel (!%p14_p5) target bundleno = 4 (0x4), region = 74 }
  0xc2   :  { %404 = vsyncpa [#allocation3], 1 }
  0xc3   :  { %406 = vsyncpa [#allocation3 + $0x1], 1 }

// kernel: _lambda_.2
= control target key start
LH: loop header
LB: loop body
LE: loop exit
PB: predicated region body
PF: predicated region fallthrough
CT: control target
= control target key end

     0   :  { %s2845_s0 = inlined_call_operand.vmem [shape: f32[2,32,256], index: 0, kind: input, shape index: {}, may-alias: {0,1}]   ;;  %s2846_s1 = inlined_call_operand.vmem [shape: f32[2,32,256], index: 1, kind: input, shape index: {}, may-alias: {0,1}]   ;;  %s2847_s2 = inlined_call_operand.vmem [shape: bf16[8,32], index: 2, kind: input, shape index: {}]   ;;  %s2848_s3 = inlined_call_operand.vmem [shape: bf16[32,32], index: 3, kind: input, shape index: {}]   ;;  %s2849_s4 = inlined_call_operand.vmem [shape: f32[32,1], index: 4, kind: input, shape index: {}]   ;;  %s2850_s5 = inlined_call_operand.vmem [shape: bf16[32,32], index: 5, kind: input, shape index: {}]   ;;  %s2851_s6 = inlined_call_operand.vmem [shape: f32[32,1], index: 6, kind: input, shape index: {}]   ;;  %s2852_s7 = inlined_call_operand.vmem [shape: bf16[32,32], index: 7, kind: input, shape index: {}]   ;;  %s2853_s8 = inlined_call_operand.vmem [shape: f32[32,1], index: 8, kind: input, shape index: {}]   ;;  %s2854_s9 = inlined_call_operand.vmem [shape: f32[2,32,256], index: 9, kind: output, shape index: {0}]   ;;  %s2855_s10 = inlined_call_operand.vmem [shape: f32[2,32,1], index: 10, kind: output, shape index: {1}]   ;;  %s2856_s11 = inlined_call_operand.vmem [shape: f32[2,32,1], index: 11, kind: output, shape index: {2}]  }
   0x1   :  { %2861 = sst [smem:[#allocation9_spill]] %s2846_s1 }
   0x2   :  { %2862 = sst [smem:[#allocation10_spill]] %s2852_s7 }
   0x3   :  { %s2252_s17 = smov 0   ;;  %s2254_s18 = smov 0  }
   0x4   :  { %s2256_s19 = smov 0   ;;  %s2258_s20 = smov 0  }
   0x5   :  { %s2260_s21 = smov 0   ;;  %s2262_s22 = smov 0  }
   0x6   :  { %s2264_s23 = smov 0  }
   0x7 LB: > { %2863 = sst [smem:[#allocation6_spill]] %s2179_s22  ;;  %s31_s24 = sadd.s32 1, %s2175_s21  ;;  %s2183_s23 = sphi %s2264_s23, %s22_s23   ;;  %s2179_s22 = sphi %s2262_s22, %s2870_s22   ;;  %s2175_s21 = sphi %s2260_s21, %s2874_s21   ;;  %s2171_s20 = sphi %s2258_s20, %s2868_s20   ;;  %s2167_s19 = sphi %s2256_s19, %s2873_s19   ;;  %s2163_s18 = sphi %s2254_s18, %s2872_s18   ;;  %s2159_s17 = sphi %s2252_s17, %s2871_s17  }
   0x8   : > { %p32_p0 = scmp.ge.s32.totalorder %s31_s24, 2  ;;  %s34_s25 = sadd.s32 1, %s2179_s22 }
   0x9   : > { %p76_p1 = scmp.ne.s32.totalorder %s2163_s18, %s2159_s17  ;;  %p77_p2 = scmp.eq.s32.totalorder %s2183_s23, 0 }
   0xa   : > { %s2876_s24 = smov (%p32_p0, %s31_s24), 0  ;;  %s2878_s25 = smov (!%p32_p0, %s34_s25), %s2179_s22 }
   0xb   : > { %2864 = sst [smem:[#allocation7_spill]] %s2876_s24  ;;  %p78_p3 = por %p77_p2, %p76_p1 }
   0xc   : > { %p36_p4 = scmp.ge.s32.totalorder %s2878_s25, 2  ;;  %s65_s26 = ssub.s32 %s2175_s21, %s2876_s24 }
   0xd   : > { %s69_s29 = sadd.s32 1, %s2163_s18  ;;  %p1874_p6 = scmp.ge.s32.totalorder %s2183_s23, 4 }
   0xe   : > { %s2880_s25 = smov (%p36_p4, %s2878_s25), 0 }
   0xf   : > { %2865 = sst [smem:[#allocation8_spill]] %s2880_s25  ;;  %s64_s27 = ssub.s32 %s2179_s22, %s2880_s25 }
  0x10   : > { %s66_s28 = sor.u32 %s65_s26, %s64_s27  ;;  %348 = sbr.rel (%p1874_p6) target bundleno = 35 (0x23), region = 44 }
  0x11   : > { %p67_p5 = scmp.eq.s32.totalorder %s66_s28, 0 }
  0x13   : > { %s2303_s30 = scalar_select %p67_p5, %s2163_s18, %s69_s29  }
  0x17   : > { %359 = sbr.rel (!%p78_p3) target bundleno = 35 (0x23), region = 52  ;;  %s361_s12 = sand.u32 (%p78_p3), 1, %s2163_s18  }
  0x18   : > { %s1876_s13 = sshll.u32 (%p78_p3), %s2179_s22, 3  ;;  %s1875_s14 = sshll.u32 (%p78_p3), %s361_s12, 5 }
  0x19   : > { %s365_s15 = sadd.s32 (%p78_p3), %s2175_s21, %s1876_s13  ;;  %s2866_s1 = sld [smem:[#allocation9_spill]] (%p78_p3) }
  0x1a   : > { %s1877_s16 = sshll.u32 (%p78_p3), %s365_s15, 3  ;;  %s363_s27 = scalar_lea.vmem (%p78_p3), [#allocation5], %s1875_s14 }
  0x1f   : > { %s367_s26 = scalar_lea.vmem %s2866_s1, %s1877_s16 }
  0x20   : > { %v401_v0 = vld [vmem:[%s367_s26] sm:$0xff]  ;;  %v403_v1 = vld [vmem:[%s367_s26 + $0x10] sm:$0xff] }
  0x21   : > { %v405_v2 = vld [vmem:[%s367_s26 + $0x20] sm:$0xff]  ;;  %402 = vst [vmem:[%s363_s27] sm:$0xff] %v401_v0  ;;  %404 = vst [vmem:[%s363_s27 + $0x8] sm:$0xff] %v403_v1  ;;  %v407_v3 = vld [vmem:[%s367_s26 + $0x30] sm:$0xff] }
  0x22   : > { %406 = vst [vmem:[%s363_s27 + $0x10] sm:$0xff] %v405_v2  ;;  %408 = vst [vmem:[%s363_s27 + $0x18] sm:$0xff] %v407_v3 }
  0x23 PF: > { %p1878_p7 = scmp.ge.s32.totalorder %s2183_s23, 1  ;;  %p413_p8 = scmp.lt.s32.totalorder %s2183_s23, 5 }
  0x25   : > { %p414_p9 = pnand %p1878_p7, %p413_p8 }
  0x26   : > { %s420_s7 = sand.u32 (!%p414_p9), 1, %s2159_s17   ;;  %p474_p10 = scmp.lt.s32.totalorder (!%p414_p9), %s2171_s20, 1 }
  0x27   : > { %417 = sbr.rel (%p414_p9) target bundleno = 2016 (0x7e0), region = 90  ;;  %s1879_s24 = sshll.u32 (!%p414_p9), %s420_s7, 5 }
  0x28   : > { %p1888_p11 = scmp.ne.s32.totalorder (!%p414_p9), %s2167_s19, 0 }
  0x2e   : > { %s2882_s20 = smov (!%p474_p10, %s2171_s20), 1  ;;  %498 = sbr.rel (%p1888_p11) target bundleno = 276 (0x114), region = 98 }
  0x2f   : > { %s1922_s28 = sshll.u32 %s2882_s20, 6  ;;  %s1924_s29 = sshll.u32 %s2882_s20, 5  ;;  %v2185_v11 = vmov (!%p1888_p11), 0   ;;  %v499_v17 = vld [vmem:[%s2847_s2] sm:$0xf] (!%p1888_p11)  ;;  %vm512_vm0 = vcmask (!%p1888_p11), 261120   ;;  %v574_v18 = vlaneseq (!%p1888_p11) }
  0x30   : > { %s2320_s14 = scalar_lea.vmem %s2845_s0, %s1922_s28  ;;  %s2325_s26 = scalar_lea.vmem %s2854_s9, %s1922_s28  ;;  %548 = vmatprep.mubr.bf16.mxu0 (!%p1888_p11), %v2185_v11  ;;  %v2186_v19 = vmov (!%p1888_p11), 0.0  }
  0x31   : > { %s2330_s25 = scalar_lea.vmem %s2855_s10, %s1924_s29  ;;  %s2335_s22 = scalar_lea.vmem %s2856_s11, %s1924_s29  ;;  %v501_v4 = vld [vmem:[%s2320_s14 + $0x8] sm:$0xff] (!%p1888_p11)  ;;  %v503_v5 = vld [vmem:[%s2320_s14 + $0x18] sm:$0xff] (!%p1888_p11)  ;;  %v500_v6 = vld [vmem:[%s2320_s14] sm:$0xff] (!%p1888_p11)  ;;  %vm576_vm1 = vcmp.lt.s32.totalorder (!%p1888_p11), %v574_v18, 256  ;;  %566 = vst [vmem:[#allocation3] sm:$0xff] (!%p1888_p11), %v2186_v19 }
  0x32   : > { %s2337_s20 = scalar_lea.vmem [#allocation5], %s1879_s24  ;;  %v509_v7 = vpack.c.bf16 (!%p1888_p11), %v503_v5, %v501_v4  ;;  %v502_v8 = vld [vmem:[%s2320_s14 + $0x10] sm:$0xff] (!%p1888_p11)  ;;  %v505_v9 = vld [vmem:[%s2320_s14 + $0x28] sm:$0xff] (!%p1888_p11)  ;;  %v507_v10 = vld [vmem:[%s2320_s14 + $0x38] sm:$0xff] (!%p1888_p11)  ;;  %567 = vst [vmem:[#allocation3 + $0x8] sm:$0xff] (!%p1888_p11), %v2186_v19 }
  0x33   : > { %v508_v12 = vpack.c.bf16 (!%p1888_p11), %v502_v8, %v500_v6  ;;  %v511_v13 = vpack.c.bf16 (!%p1888_p11), %v507_v10, %v505_v9  ;;  %v504_v14 = vld [vmem:[%s2320_s14 + $0x20] sm:$0xff] (!%p1888_p11)  ;;  %v506_v15 = vld [vmem:[%s2320_s14 + $0x30] sm:$0xff] (!%p1888_p11)  ;;  %568 = vst [vmem:[#allocation3 + $0x10] sm:$0xff] (!%p1888_p11), %v2186_v19  ;;  %569 = vst [vmem:[#allocation3 + $0x18] sm:$0xff] (!%p1888_p11), %v2186_v19 }
  0x34   : > { %516 = vmatprep.subr.bf16.mxu0 (!%p1888_p11), %v509_v7  ;;  %v510_v16 = vpack.c.bf16 (!%p1888_p11), %v506_v15, %v504_v14  ;;  %570 = vst [vmem:[#allocation3 + $0x20] sm:$0xff] (!%p1888_p11), %v2186_v19  ;;  %571 = vst [vmem:[#allocation3 + $0x28] sm:$0xff] (!%p1888_p11), %v2186_v19 }
  0x35   : > { %517 = vmatpush1.bf16.msra.mxu0 %v508_v12  ;;  %572 = vst [vmem:[#allocation3 + $0x30] sm:$0xff] %v2186_v19  ;;  %573 = vst [vmem:[#allocation3 + $0x38] sm:$0xff] %v2186_v19 }
  0x36   : > { %518 = vmatprep.subr.bf16.mxu0 %v511_v13  ;;  %578 = vst.msk [vmem:[#allocation4] sm:$0x3] %vm576_vm1, %v2186_v19 }
  0x39   : > { %519 = vmatpush1.bf16.msra.mxu0 %v510_v16 }
  0x3c   : > { %1889 = vmatmul.mubr.msk.bf16.vlgmr.msra.gmra.mrb[0].mxu0 %vm512_vm0, %v499_v17 }
 0x10f   : > { %v550_v20 = vpop.f32.mrb[0].mxu0 }
 0x110   : > { %v552_v21 = vpop.f32.mrb[1].mxu0 }
 0x111   : > { %v1926_v22 = vpack.c.bf16 %v552_v21, %v550_v20  ;;  %v554_v23 = vpop.f32.mrb[2].mxu0 }
 0x112   : > { %v555_v24 = vpop.f32.mrb[3].mxu0 }
 0x113   : > { %565 = vst [vmem:[#allocation2] sm:$0xff] %v1926_v22 }
 0x114 PF: > { %v579_v25 = vld [vmem:[%s2337_s20] sm:$0xff]  ;;  %v580_v26 = vld [vmem:[%s2337_s20 + $0x8] sm:$0xff]  ;;  %v581_v27 = vld [vmem:[%s2337_s20 + $0x10] sm:$0xff]  ;;  %v2187_v28 = vmov 0.0   ;;  %vm2188_vm2 = vmmov 0   ;;  %vm586_vm3 = vcmask 261120  }
 0x115   : > { %1934 = vmatprep.subr.bf16.mxu1 %v2187_v28  ;;  %v583_v29 = vpack.c.bf16 %v580_v26, %v579_v25  ;;  %v582_v30 = vld [vmem:[%s2337_s20 + $0x18] sm:$0xff]  ;;  %1938 = vmatprep.mubr.msk.bf16.mxu1 %vm2188_vm2, %v2187_v28  ;;  %vm771_vm4 = vcmask 1043456   ;;  %v2189_v36 = vmov 0   ;;  %vm746_vm5 = vcmask 64512   ;;  %p1907_p12 = scmp.ne.s32.totalorder %s2167_s19, 1 }
 0x116   : > { %v584_v31 = vpack.c.bf16 %v582_v30, %v581_v27  ;;  %v585_v32 = vld [vmem:[%s2847_s2] sm:$0xf]  ;;  %810 = vmatprep.mubr.bf16.mxu0 %v2189_v36  ;;  %2017 = vset.pattern.permute.xlu1 %v2189_v36  ;;  %v2022_v52 = vld [vmem:[%s2848_s3 + $0x8] sm:$0xff]   ;;  %s2867_s27 = sld [smem:[#allocation10_spill]] (!%p1907_p12)  ;;  %vm1690_vm7 = vcmask (!%p1907_p12), 7168  }
 0x117   : > { %1935 = vmatpush3.bf16.msra.mxu1 %v583_v29  ;;  %v2021_v51 = vld [vmem:[%s2848_s3] sm:$0xff]  }
 0x118   : > { %1936 = vmatprep.subr.bf16.mxu1 %v2187_v28 }
 0x11a   : > { %v724_v33 = vld [vmem:[#allocation2] sm:$0xff] }
 0x11b   : > { %1937 = vmatpush3.bf16.msra.mxu1 %v584_v31  ;;  %v1897_v34 = vcombine.high %v724_v33, %v724_v33  ;;  %v1896_v35 = vcombine.low %v724_v33, %v724_v33 }
 0x11c   : > { %1942 = vmatprep.subr.bf16.mxu1 %v583_v29 }
 0x11d   : > { %1898 = vmatprep.subr.msk.bf16.mxu0 %vm771_vm4, %v1897_v34  ;;  %v773_v37 = vsel %vm771_vm4, %v1896_v35, 0 }
 0x11e   : > { %1939 = vmatmul.mubr.msk.bf16.vlgmr.msra.gmra.mrb[0].mxu1 %vm586_vm3, %v585_v32  ;;  %779 = vmatpush1.bf16.msra.mxu0 %v773_v37 }
 0x11f   : > { %1943 = vmatpush3.bf16.msra.mxu1 %v583_v29  ;;  %1946 = vmatprep.mubr.msk.bf16.mxu1 %vm586_vm3, %v2021_v51 }
 0x120   : > { %1944 = vmatprep.subr.bf16.mxu1 %v584_v31 }
 0x123   : > { %1945 = vmatpush3.bf16.msra.mxu1 %v584_v31 }
 0x126   : > { %1947 = vmatmul.mubr.msk.bf16.vlgmr.msra.gmra.mrb[4].mxu1 %vm586_vm3, %v2022_v52 }
 0x127   : > { %1256 = vmatprep.mubr.bf16.mxu1 %v2189_v36 }
 0x1f1   : > { %v624_v38 = vpop.f32.mrb[0].mxu1 }
 0x1f2   : > { %v1940_v39 = vpop.f32.mrb[1].mxu1  ;;  %v723_v40 = vpack.c.bf16 %v624_v38, %v624_v38  ;;  %v634_v38 = vld [vmem:[%s2849_s4] sm:$0xff] }
 0x1f3   : > { %v627_v41 = vpop.f32.mrb[2].mxu1 }
 0x1f4   : > { %725 = vxpose.xlu0.c.b16.start.end [1/1] (short) %v723_v40, 128  ;;  %v1941_v42 = vpop.f32.mrb[3].mxu1 }
 0x1fd   : > { %2018 = vset.pattern.permute.xlu0 %v2189_v36 }
 0x25a   : > { %v733_v43 = vpop.trf.xlu0 }
 0x25b   : > { %1899 = vmatmul.mubr.msk.bf16.vlgmr.msra.gmra.mrb[0].mxu0 %vm746_vm5, %v733_v43 }
 0x25c   : > { %820 = vmatprep.mubr.bf16.mxu0 %v2189_v36 }
 0x25e   : > { %v734_v44 = vpop.trf.xlu0 }
 0x262   : > { %v735_v45 = vpop.trf.xlu0 }
 0x263   : > { %1900 = vmatmul.mubr.msk.bf16.gmra.mrb[4].mxu0 %vm746_vm5, %v734_v44 }
 0x264   : > { %830 = vmatprep.mubr.bf16.mxu0 %v2189_v36 }
 0x266   : > { %v736_v46 = vpop.trf.xlu0 }
 0x26a   : > { %v737_v47 = vpop.trf.xlu0 }
 0x26b   : > { %1901 = vmatmul.mubr.msk.bf16.gmra.mrb[8].mxu0 %vm746_vm5, %v735_v45 }
 0x26c   : > { %840 = vmatprep.mubr.bf16.mxu0 %v2189_v36 }
 0x26e   : > { %v738_v48 = vpop.trf.xlu0 }
 0x272   : > { %v739_v49 = vpop.trf.xlu0 }
 0x273   : > { %1902 = vmatmul.mubr.msk.bf16.gmra.mrb[12].mxu0 %vm746_vm5, %v736_v46 }
 0x274   : > { %850 = vmatprep.mubr.bf16.mxu0 %v2189_v36 }
 0x276   : > { %v740_v50 = vpop.trf.xlu0 }
 0x27b   : > { %1903 = vmatmul.mubr.msk.bf16.gmra.mrb[16].mxu0 %vm746_vm5, %v737_v47  ;;  %v2489_v47 = vpop.f32.mrb[4].mxu1 }
 0x27c   : > { %860 = vmatprep.mubr.bf16.mxu0 %v2189_v36 }
 0x283   : > { %1904 = vmatmul.mubr.msk.bf16.gmra.mrb[20].mxu0 %vm746_vm5, %v738_v48  ;;  %v2491_v48 = vpop.f32.mrb[5].mxu1 }
 0x284   : > { %870 = vmatprep.mubr.bf16.mxu0 %v2189_v36 }
 0x28b   : > { %1905 = vmatmul.mubr.msk.bf16.gmra.mrb[24].mxu0 %vm746_vm5, %v739_v49 }
 0x28c   : > { %880 = vmatprep.mubr.bf16.mxu0 %v2189_v36 }
 0x293   : > { %1906 = vmatmul.mubr.msk.bf16.gmra.mrb[28].mxu0 %vm746_vm5, %v740_v50 }
 0x32e   : > { %v2386_v53 = vpop.f32.mrb[0].mxu0 }
 0x32f   : > { %v2388_v54 = vpop.f32.mrb[1].mxu0 }
 0x330   : > { %v2390_v55 = vpop.f32.mrb[2].mxu0  ;;  %v891_v56 = vmax.f32 %v2386_v53, %v2388_v54 }
 0x331   : > { %v2394_v57 = vpop.f32.mrb[3].mxu0 }
 0x332   : > { %892 = vmax.xlane.f32.xlu0 %v891_v56  ;;  %v894_v58 = vmax.f32 %v2390_v55, %v2394_v57 }
 0x334   : > { %895 = vmax.xlane.f32.xlu1 %v894_v58 }
 0x336   : > { %v2398_v59 = vpop.f32.mrb[4].mxu0 }
 0x337   : > { %v2400_v60 = vpop.f32.mrb[5].mxu0 }
 0x338   : > { %v2402_v61 = vpop.f32.mrb[6].mxu0  ;;  %v897_v62 = vmax.f32 %v2398_v59, %v2400_v60 }
 0x339   : > { %v2406_v63 = vpop.f32.mrb[7].mxu0 }
 0x33a   : > { %898 = vmax.xlane.f32.xlu1 %v897_v62  ;;  %v900_v0 = vmax.f32 %v2402_v61, %v2406_v63 }
 0x33e   : > { %901 = vmax.xlane.f32.xlu1 %v900_v0  ;;  %v2410_v1 = vpop.f32.mrb[8].mxu0 }
 0x33f   : > { %v2412_v2 = vpop.f32.mrb[9].mxu0 }
 0x340   : > { %v2414_v3 = vpop.f32.mrb[10].mxu0  ;;  %v903_v4 = vmax.f32 %v2410_v1, %v2412_v2 }
 0x341   : > { %v2418_v5 = vpop.f32.mrb[11].mxu0 }
 0x342   : > { %904 = vmax.xlane.f32.xlu1 %v903_v4  ;;  %v906_v6 = vmax.f32 %v2414_v3, %v2418_v5 }
 0x346   : > { %907 = vmax.xlane.f32.xlu1 %v906_v6  ;;  %v2422_v7 = vpop.f32.mrb[12].mxu0 }
 0x347   : > { %v2424_v8 = vpop.f32.mrb[13].mxu0 }
 0x348   : > { %v2426_v9 = vpop.f32.mrb[14].mxu0  ;;  %v909_v10 = vmax.f32 %v2422_v7, %v2424_v8 }
 0x349   : > { %v2430_v11 = vpop.f32.mrb[15].mxu0 }
 0x34a   : > { %910 = vmax.xlane.f32.xlu1 %v909_v10  ;;  %v912_v12 = vmax.f32 %v2426_v9, %v2430_v11 }
 0x34e   : > { %913 = vmax.xlane.f32.xlu1 %v912_v12  ;;  %v2434_v13 = vpop.f32.mrb[16].mxu0 }
 0x34f   : > { %v2436_v14 = vpop.f32.mrb[17].mxu0 }
 0x350   : > { %v2438_v15 = vpop.f32.mrb[18].mxu0  ;;  %v915_v16 = vmax.f32 %v2434_v13, %v2436_v14 }
 0x351   : > { %v2442_v17 = vpop.f32.mrb[19].mxu0 }
 0x352   : > { %916 = vmax.xlane.f32.xlu1 %v915_v16  ;;  %v918_v18 = vmax.f32 %v2438_v15, %v2442_v17 }
 0x356   : > { %919 = vmax.xlane.f32.xlu1 %v918_v18  ;;  %v2446_v19 = vpop.f32.mrb[20].mxu0 }
 0x357   : > { %v2448_v20 = vpop.f32.mrb[21].mxu0 }
 0x358   : > { %v2450_v21 = vpop.f32.mrb[22].mxu0  ;;  %v921_v22 = vmax.f32 %v2446_v19, %v2448_v20 }
 0x359   : > { %v2454_v23 = vpop.f32.mrb[23].mxu0 }
 0x35a   : > { %922 = vmax.xlane.f32.xlu1 %v921_v22  ;;  %v924_v24 = vmax.f32 %v2450_v21, %v2454_v23 }
 0x35e   : > { %925 = vmax.xlane.f32.xlu1 %v924_v24  ;;  %v2458_v25 = vpop.f32.mrb[24].mxu0 }
 0x35f   : > { %v2460_v26 = vpop.f32.mrb[25].mxu0 }
 0x360   : > { %v2462_v27 = vpop.f32.mrb[26].mxu0  ;;  %v927_v28 = vmax.f32 %v2458_v25, %v2460_v26 }
 0x361   : > { %v2466_v29 = vpop.f32.mrb[27].mxu0 }
 0x362   : > { %928 = vmax.xlane.f32.xlu1 %v927_v28  ;;  %v930_v30 = vmax.f32 %v2462_v27, %v2466_v29 }
 0x364   : > { %931 = vmax.xlane.f32.xlu0 %v930_v30 }
 0x366   : > { %v2470_v31 = vpop.f32.mrb[28].mxu0 }
 0x367   : > { %v2472_v32 = vpop.f32.mrb[29].mxu0 }
 0x368   : > { %v2474_v33 = vpop.f32.mrb[30].mxu0  ;;  %v933_v34 = vmax.f32 %v2470_v31, %v2472_v32 }
 0x369   : > { %v2478_v35 = vpop.f32.mrb[31].mxu0 }
 0x36a   : > { %v936_v37 = vmax.f32 %v2474_v33, %v2478_v35  ;;  %934 = vmax.xlane.f32.xlu1 %v933_v34 }
 0x36c   : > { %937 = vmax.xlane.f32.xlu0 %v936_v37 }
 0x37b   : > { %640 = vperm.xlu1 %2017, %v634_v38  }
 0x3bf   : > { %v893_v39 = vpop.xlane.xlu0 %892 }
 0x3c0   : > { %v939_v40 = vsub.f32 %v2386_v53, %v893_v39  ;;  %v940_v41 = vsub.f32 %v2388_v54, %v893_v39 }
 0x3c1   : > { %v896_v42 = vpop.xlane.xlu1 %895 }
 0x3c2   : > { %v971_v43 = vmul.f32 1.442695, %v939_v40  ;;  %v973_v44 = vmul.f32 1.442695, %v940_v41  ;;  %v941_v45 = vsub.f32 %v2390_v55, %v896_v42  ;;  %v942_v46 = vsub.f32 %v2394_v57, %v896_v42 }
 0x3c4   : > { %2023 = vpow2.f32 %v971_v43  ;;  %v975_v49 = vmul.f32 1.442695, %v941_v45  ;;  %v977_v50 = vmul.f32 1.442695, %v942_v46 }
 0x3c5   : > { %2025 = vpow2.f32 %v973_v44 }
 0x3c6   : > { %2027 = vpow2.f32 %v975_v49 }
 0x3c7   : > { %2029 = vpow2.f32 %v977_v50  ;;  %v899_v51 = vpop.xlane.xlu1 %898 }
 0x3c8   : > { %v943_v52 = vsub.f32 %v2398_v59, %v899_v51  ;;  %v944_v53 = vsub.f32 %v2400_v60, %v899_v51 }
 0x3ca   : > { %v979_v54 = vmul.f32 1.442695, %v943_v52  ;;  %v981_v56 = vmul.f32 1.442695, %v944_v53 }
 0x3cb   : > { %v902_v55 = vpop.xlane.xlu1 %901 }
 0x3cc   : > { %2031 = vpow2.f32 %v979_v54  ;;  %v945_v57 = vsub.f32 %v2402_v61, %v902_v55  ;;  %v946_v58 = vsub.f32 %v2406_v63, %v902_v55 }
 0x3cd   : > { %2033 = vpow2.f32 %v981_v56 }
 0x3ce   : > { %v2497_v62 = vpop.eup %2023  ;;  %v983_v0 = vmul.f32 1.442695, %v945_v57  ;;  %v985_v4 = vmul.f32 1.442695, %v946_v58 }
 0x3cf   : > { %v2499_v6 = vpop.eup %2025  ;;  %v905_v10 = vpop.xlane.xlu1 %904 }
 0x3d0   : > { %v2501_v12 = vpop.eup %2027  ;;  %2035 = vpow2.f32 %v983_v0  ;;  %v947_v59 = vsub.f32 %v2410_v1, %v905_v10  ;;  %v948_v60 = vsub.f32 %v2412_v2, %v905_v10  ;;  %v1035_v61 = vadd.f32 %v2499_v6, %v2497_v62 }
 0x3d1   : > { %v2507_v16 = vpop.eup %2029  ;;  %2037 = vpow2.f32 %v985_v4 }
 0x3d2   : > { %v987_v63 = vmul.f32 1.442695, %v947_v59  ;;  %v989_v18 = vmul.f32 1.442695, %v948_v60  ;;  %1036 = vadd.xlane.f32.xlu1 %v1035_v61  ;;  %v1038_v22 = vadd.f32 %v2507_v16, %v2501_v12 }
 0x3d3   : > { %v908_v24 = vpop.xlane.xlu1 %907 }
 0x3d4   : > { %2039 = vpow2.f32 %v987_v63  ;;  %v949_v28 = vsub.f32 %v2414_v3, %v908_v24  ;;  %v950_v1 = vsub.f32 %v2418_v5, %v908_v24  ;;  %1039 = vadd.xlane.f32.xlu0 %v1038_v22 }
 0x3d5   : > { %2041 = vpow2.f32 %v989_v18 }
 0x3d6   : > { %v2513_v2 = vpop.eup %2031  ;;  %v991_v30 = vmul.f32 1.442695, %v949_v28  ;;  %v993_v34 = vmul.f32 1.442695, %v950_v1 }
 0x3d7   : > { %v2515_v37 = vpop.eup %2033  ;;  %v911_v38 = vpop.xlane.xlu1 %910 }
 0x3d8   : > { %2043 = vpow2.f32 %v991_v30  ;;  %v951_v39 = vsub.f32 %v2422_v7, %v911_v38  ;;  %v952_v40 = vsub.f32 %v2424_v8, %v911_v38  ;;  %v1041_v41 = vadd.f32 %v2515_v37, %v2513_v2 }
 0x3d9   : > { %2045 = vpow2.f32 %v993_v34 }
 0x3da   : > { %v2521_v3 = vpop.eup %2035  ;;  %v995_v5 = vmul.f32 1.442695, %v951_v39  ;;  %v997_v42 = vmul.f32 1.442695, %v952_v40  ;;  %1042 = vadd.xlane.f32.xlu1 %v1041_v41 }
 0x3db   : > { %v2523_v43 = vpop.eup %2037  ;;  %v914_v44 = vpop.xlane.xlu1 %913 }
 0x3dc   : > { %2047 = vpow2.f32 %v995_v5  ;;  %v953_v45 = vsub.f32 %v2426_v9, %v914_v44  ;;  %v954_v46 = vsub.f32 %v2430_v11, %v914_v44  ;;  %v1044_v7 = vadd.f32 %v2523_v43, %v2521_v3 }
 0x3dd   : > { %2049 = vpow2.f32 %v997_v42 }
 0x3de   : > { %v2529_v8 = vpop.eup %2039  ;;  %v999_v49 = vmul.f32 1.442695, %v953_v45  ;;  %v1001_v50 = vmul.f32 1.442695, %v954_v46  ;;  %1045 = vadd.xlane.f32.xlu0 %v1044_v7 }
 0x3df   : > { %v2531_v51 = vpop.eup %2041  ;;  %v917_v52 = vpop.xlane.xlu1 %916 }
 0x3e0   : > { %2051 = vpow2.f32 %v999_v49  ;;  %v955_v53 = vsub.f32 %v2434_v13, %v917_v52  ;;  %v956_v54 = vsub.f32 %v2436_v14, %v917_v52  ;;  %v1047_v9 = vadd.f32 %v2531_v51, %v2529_v8 }
 0x3e1   : > { %2053 = vpow2.f32 %v1001_v50 }
 0x3e2   : > { %v2537_v11 = vpop.eup %2043  ;;  %v1003_v56 = vmul.f32 1.442695, %v955_v53  ;;  %v1005_v55 = vmul.f32 1.442695, %v956_v54  ;;  %1048 = vadd.xlane.f32.xlu1 %v1047_v9 }
 0x3e3   : > { %v2539_v57 = vpop.eup %2045  ;;  %v920_v58 = vpop.xlane.xlu1 %919 }
 0x3e4   : > { %2055 = vpow2.f32 %v1003_v56  ;;  %v957_v0 = vsub.f32 %v2438_v15, %v920_v58  ;;  %v958_v4 = vsub.f32 %v2442_v17, %v920_v58  ;;  %v1050_v13 = vadd.f32 %v2539_v57, %v2537_v11 }
 0x3e5   : > { %2057 = vpow2.f32 %v1005_v55 }
 0x3e6   : > { %v2545_v14 = vpop.eup %2047  ;;  %v1007_v10 = vmul.f32 1.442695, %v957_v0  ;;  %v1009_v59 = vmul.f32 1.442695, %v958_v4  ;;  %1051 = vadd.xlane.f32.xlu0 %v1050_v13 }
 0x3e7   : > { %v2547_v60 = vpop.eup %2049  ;;  %v923_v61 = vpop.xlane.xlu1 %922 }
 0x3e8   : > { %2059 = vpow2.f32 %v1007_v10  ;;  %v959_v63 = vsub.f32 %v2446_v19, %v923_v61  ;;  %v960_v18 = vsub.f32 %v2448_v20, %v923_v61  ;;  %v1053_v15 = vadd.f32 %v2547_v60, %v2545_v14 }
 0x3e9   : > { %2061 = vpow2.f32 %v1009_v59 }
 0x3ea   : > { %v2553_v17 = vpop.eup %2051  ;;  %v1011_v22 = vmul.f32 1.442695, %v959_v63  ;;  %v1013_v24 = vmul.f32 1.442695, %v960_v18  ;;  %1054 = vadd.xlane.f32.xlu1 %v1053_v15 }
 0x3eb   : > { %v2555_v28 = vpop.eup %2053  ;;  %v926_v1 = vpop.xlane.xlu1 %925 }
 0x3ec   : > { %2063 = vpow2.f32 %v1011_v22  ;;  %v961_v30 = vsub.f32 %v2450_v21, %v926_v1  ;;  %v962_v34 = vsub.f32 %v2454_v23, %v926_v1  ;;  %v1056_v19 = vadd.f32 %v2555_v28, %v2553_v17 }
 0x3ed   : > { %2065 = vpow2.f32 %v1013_v24 }
 0x3ee   : > { %v2561_v20 = vpop.eup %2055  ;;  %v1015_v38 = vmul.f32 1.442695, %v961_v30  ;;  %v1017_v39 = vmul.f32 1.442695, %v962_v34  ;;  %1057 = vadd.xlane.f32.xlu0 %v1056_v19 }
 0x3ef   : > { %v2563_v40 = vpop.eup %2057  ;;  %v929_v41 = vpop.xlane.xlu1 %928 }
 0x3f0   : > { %2067 = vpow2.f32 %v1015_v38  ;;  %v963_v5 = vsub.f32 %v2458_v25, %v929_v41  ;;  %v964_v42 = vsub.f32 %v2460_v26, %v929_v41  ;;  %v1059_v21 = vadd.f32 %v2563_v40, %v2561_v20  ;;  %v637_v41 = vld [vmem:[%s2849_s4 + $0x18] sm:$0xff] }
 0x3f1   : > { %2069 = vpow2.f32 %v1017_v39  ;;  %v932_v23 = vpop.xlane.xlu0 %931  ;;  %v636_v39 = vld [vmem:[%s2849_s4 + $0x10] sm:$0xff] }
 0x3f2   : > { %v2569_v44 = vpop.eup %2059  ;;  %v1019_v45 = vmul.f32 1.442695, %v963_v5  ;;  %v1021_v46 = vmul.f32 1.442695, %v964_v42  ;;  %1060 = vadd.xlane.f32.xlu1 %v1059_v21  ;;  %v965_v7 = vsub.f32 %v2462_v27, %v932_v23  ;;  %v966_v49 = vsub.f32 %v2466_v29, %v932_v23  ;;  %v635_v5 = vld [vmem:[%s2849_s4 + $0x8] sm:$0xff]  ;;  %v2626_v42 = vpop.f32.mrb[6].mxu1 }
 0x3f3   : > { %v2573_v50 = vpop.eup %2061  ;;  %v2628_v21 = vpop.f32.mrb[7].mxu1 }
 0x3f4   : > { %2071 = vpow2.f32 %v1019_v45  ;;  %v1023_v25 = vmul.f32 1.442695, %v965_v7  ;;  %v1025_v52 = vmul.f32 1.442695, %v966_v49  ;;  %v1062_v26 = vadd.f32 %v2573_v50, %v2569_v44 }
 0x3f5   : > { %2073 = vpow2.f32 %v1021_v46 }
 0x3f6   : > { %v2577_v53 = vpop.eup %2063  ;;  %2075 = vpow2.f32 %v1023_v25  ;;  %1063 = vadd.xlane.f32.xlu0 %v1062_v26 }
 0x3f7   : > { %v2579_v54 = vpop.eup %2065  ;;  %2077 = vpow2.f32 %v1025_v52  ;;  %v935_v9 = vpop.xlane.xlu1 %934 }
 0x3f8   : > { %v967_v27 = vsub.f32 %v2470_v31, %v935_v9  ;;  %v968_v29 = vsub.f32 %v2472_v32, %v935_v9  ;;  %v1065_v56 = vadd.f32 %v2579_v54, %v2577_v53 }
 0x3f9   : > { %v938_v55 = vpop.xlane.xlu0 %937 }
 0x3fa   : > { %v2585_v58 = vpop.eup %2067  ;;  %v1027_v0 = vmul.f32 1.442695, %v967_v27  ;;  %v1029_v4 = vmul.f32 1.442695, %v968_v29  ;;  %1066 = vadd.xlane.f32.xlu1 %v1065_v56  ;;  %v969_v13 = vsub.f32 %v2474_v33, %v938_v55  ;;  %v970_v10 = vsub.f32 %v2478_v35, %v938_v55 }
 0x3fb   : > { %v2589_v59 = vpop.eup %2069  ;;  %v2630_v23 = vpop.permute.xlu1 %640 }
 0x3fc   : > { %2079 = vpow2.f32 %v1027_v0  ;;  %v1031_v61 = vmul.f32 1.442695, %v969_v13  ;;  %v1033_v31 = vmul.f32 1.442695, %v970_v10  ;;  %v1068_v32 = vadd.f32 %v2589_v59, %v2585_v58 }
 0x3fd   : > { %2081 = vpow2.f32 %v1029_v4 }
 0x3fe   : > { %v2593_v63 = vpop.eup %2071  ;;  %2083 = vpow2.f32 %v1031_v61  ;;  %1069 = vadd.xlane.f32.xlu0 %v1068_v32 }
 0x3ff   : > { %v2595_v18 = vpop.eup %2073  ;;  %2085 = vpow2.f32 %v1033_v31 }
 0x400   : > { %v2597_v15 = vpop.eup %2075  ;;  %v1071_v33 = vadd.f32 %v2595_v18, %v2593_v63 }
 0x401   : > { %v2601_v35 = vpop.eup %2077 }
 0x402   : > { %1072 = vadd.xlane.f32.xlu1 %v1071_v33  ;;  %v1074_v22 = vadd.f32 %v2601_v35, %v2597_v15 }
 0x404   : > { %1075 = vadd.xlane.f32.xlu0 %v1074_v22 }
 0x406   : > { %v2605_v24 = vpop.eup %2079 }
 0x407   : > { %v2607_v1 = vpop.eup %2081 }
 0x408   : > { %v2609_v30 = vpop.eup %2083  ;;  %v1077_v34 = vadd.f32 %v2607_v1, %v2605_v24 }
 0x409   : > { %v2613_v19 = vpop.eup %2085 }
 0x40a   : > { %1078 = vadd.xlane.f32.xlu1 %v1077_v34  ;;  %v1080_v38 = vadd.f32 %v2613_v19, %v2609_v30 }
 0x40c   : > { %1081 = vadd.xlane.f32.xlu0 %v1080_v38 }
 0x41b   : > { %650 = vperm.xlu1 %2017, %v636_v39  }
 0x41f   : > { %655 = vperm.xlu1 %2017, %v637_v41  }
 0x422   : > { %645 = vperm.xlu0 %2018, %v635_v5  }
 0x45f   : > { %v1037_v45 = vpop.xlane.xlu1 %1036 }
 0x460   : > { %2087 = vrcp.f32 %v1037_v45 }
 0x461   : > { %v1040_v46 = vpop.xlane.xlu0 %1039 }
 0x462   : > { %2089 = vrcp.f32 %v1040_v46 }
 0x467   : > { %v1043_v7 = vpop.xlane.xlu1 %1042 }
 0x468   : > { %2091 = vrcp.f32 %v1043_v7 }
 0x46a   : > { %v2088_v49 = vpop.eup %2087 }
 0x46b   : > { %v1046_v25 = vpop.xlane.xlu0 %1045  ;;  %v1100_v26 = vmul.f32 %v2088_v49, %v2499_v6  ;;  %v1099_v27 = vmul.f32 %v2088_v49, %v2497_v62 }
 0x46c   : > { %v2090_v52 = vpop.eup %2089  ;;  %2093 = vrcp.f32 %v1046_v25 }
 0x46d   : > { %v1102_v9 = vmul.f32 %v2090_v52, %v2507_v16  ;;  %v1101_v29 = vmul.f32 %v2090_v52, %v2501_v12 }
 0x46f   : > { %v1049_v56 = vpop.xlane.xlu1 %1048  ;;  %v1209_v55 = vpack.c.bf16 %v1102_v9, %v1100_v26  ;;  %v1208_v0 = vpack.c.bf16 %v1101_v29, %v1099_v27  ;;  %v1153_v25 = vadd.f32 %v1102_v9, %v1100_v26 }
 0x470   : > { %2095 = vrcp.f32 %v1049_v56 }
 0x471   : > { %1224 = vmatprep.subr.bf16.mxu1 %v1209_v55 }
 0x472   : > { %1225 = vmatpush1.bf16.msra.mxu1 %v1208_v0  ;;  %v2092_v13 = vpop.eup %2091 }
 0x473   : > { %v1052_v4 = vpop.xlane.xlu0 %1051  ;;  %v1104_v31 = vmul.f32 %v2092_v13, %v2515_v37  ;;  %v1103_v16 = vmul.f32 %v2092_v13, %v2513_v2 }
 0x474   : > { %2097 = vrcp.f32 %v1052_v4 }
 0x475   : > { %v1154_v55 = vadd.f32 %v1153_v25, %v1104_v31 }
 0x476   : > { %v2094_v10 = vpop.eup %2093 }
 0x477   : > { %v1055_v61 = vpop.xlane.xlu1 %1054  ;;  %v1106_v6 = vmul.f32 %v2094_v10, %v2523_v43  ;;  %v1105_v62 = vmul.f32 %v2094_v10, %v2521_v3 }
 0x478   : > { %2099 = vrcp.f32 %v1055_v61 }
 0x479   : > { %v1211_v12 = vpack.c.bf16 %v1106_v6, %v1104_v31  ;;  %v1210_v32 = vpack.c.bf16 %v1105_v62, %v1103_v16  ;;  %v1155_v10 = vadd.f32 %v1154_v55, %v1106_v6 }
 0x47a   : > { %v2096_v22 = vpop.eup %2095 }
 0x47b   : > { %1226 = vmatprep.subr.bf16.mxu1 %v1211_v12  ;;  %v1058_v33 = vpop.xlane.xlu0 %1057  ;;  %v1108_v39 = vmul.f32 %v2096_v22, %v2531_v51  ;;  %v1107_v43 = vmul.f32 %v2096_v22, %v2529_v8 }
 0x47c   : > { %2101 = vrcp.f32 %v1058_v33  ;;  %1227 = vmatpush1.bf16.msra.mxu1 %v1210_v32 }
 0x47e   : > { %v2098_v34 = vpop.eup %2097 }
 0x47f   : > { %v1061_v38 = vpop.xlane.xlu1 %1060  ;;  %v1110_v37 = vmul.f32 %v2098_v34, %v2539_v57  ;;  %v1109_v2 = vmul.f32 %v2098_v34, %v2537_v11  ;;  %v1132_v11 = vadd.f32 %v1101_v29, %v1099_v27 }
 0x480   : > { %2103 = vrcp.f32 %v1061_v38 }
 0x481   : > { %v1213_v41 = vpack.c.bf16 %v1110_v37, %v1108_v39  ;;  %v1212_v3 = vpack.c.bf16 %v1109_v2, %v1107_v43  ;;  %v1133_v0 = vadd.f32 %v1132_v11, %v1103_v16 }
 0x482   : > { %v2100_v45 = vpop.eup %2099 }
 0x483   : > { %1228 = vmatprep.subr.bf16.mxu1 %v1213_v41  ;;  %v1064_v5 = vpop.xlane.xlu0 %1063  ;;  %v1112_v49 = vmul.f32 %v2100_v45, %v2547_v60  ;;  %v1111_v57 = vmul.f32 %v2100_v45, %v2545_v14  ;;  %v1134_v61 = vadd.f32 %v1133_v0, %v1105_v62 }
 0x484   : > { %2105 = vrcp.f32 %v1064_v5  ;;  %1229 = vmatpush1.bf16.msra.mxu1 %v1212_v3 }
 0x485   : > { %v1135_v12 = vadd.f32 %v1134_v61, %v1107_v43  ;;  %v709_v61 = vadd.f32 %v2491_v48, %v2630_v23 }
 0x486   : > { %v2102_v46 = vpop.eup %2101 }
 0x487   : > { %v1067_v7 = vpop.xlane.xlu1 %1066  ;;  %v1114_v51 = vmul.f32 %v2102_v46, %v2555_v28  ;;  %v1113_v8 = vmul.f32 %v2102_v46, %v2553_v17  ;;  %v1156_v28 = vadd.f32 %v1155_v10, %v1108_v39  ;;  %v1136_v31 = vadd.f32 %v1135_v12, %v1109_v2 }
 0x488   : > { %2107 = vrcp.f32 %v1067_v7 }
 0x489   : > { %v1215_v52 = vpack.c.bf16 %v1114_v51, %v1112_v49  ;;  %v1214_v56 = vpack.c.bf16 %v1113_v8, %v1111_v57  ;;  %v1157_v29 = vadd.f32 %v1156_v28, %v1110_v37  ;;  %v1137_v33 = vadd.f32 %v1136_v31, %v1111_v57 }
 0x48a   : > { %v2104_v13 = vpop.eup %2103 }
 0x48b   : > { %1230 = vmatprep.subr.bf16.mxu1 %v1215_v52  ;;  %v1070_v4 = vpop.xlane.xlu0 %1069  ;;  %v1116_v17 = vmul.f32 %v2104_v13, %v2563_v40  ;;  %v1115_v9 = vmul.f32 %v2104_v13, %v2561_v20  ;;  %v1158_v32 = vadd.f32 %v1157_v29, %v1112_v49  ;;  %v1138_v38 = vadd.f32 %v1137_v33, %v1113_v8 }
 0x48c   : > { %2109 = vrcp.f32 %v1070_v4  ;;  %1231 = vmatpush1.bf16.msra.mxu1 %v1214_v56 }
 0x48d   : > { %v1159_v34 = vadd.f32 %v1158_v32, %v1114_v51  ;;  %v1139_v39 = vadd.f32 %v1138_v38, %v1115_v9  ;;  %v1180_v32 = vlaneseq }
 0x48e   : > { %v2106_v60 = vpop.eup %2105 }
 0x48f   : > { %v1073_v14 = vpop.xlane.xlu1 %1072  ;;  %v1118_v26 = vmul.f32 %v2106_v60, %v2573_v50  ;;  %v1117_v27 = vmul.f32 %v2106_v60, %v2569_v44  ;;  %v1160_v50 = vadd.f32 %v1159_v34, %v1116_v17  ;;  %v2670_v38 = vshrl.u32 %v1180_v32, 7 }
 0x490   : > { %2111 = vrcp.f32 %v1073_v14  ;;  %vm1195_vm6 = vcmp.lt.s32.totalorder %v1180_v32, 256  ;;  %v1313_v32 = vld [vmem:[%s2849_s4] sm:$0xff] (!%p1907_p12) }
 0x491   : > { %v1076_v16 = vpop.xlane.xlu0 %1075  ;;  %v1217_v6 = vpack.c.bf16 %v1118_v26, %v1116_v17  ;;  %v1216_v62 = vpack.c.bf16 %v1117_v27, %v1115_v9  ;;  %v1161_v41 = vadd.f32 %v1160_v50, %v1118_v26  ;;  %v1140_v3 = vadd.f32 %v1139_v39, %v1117_v27 }
 0x492   : > { %2113 = vrcp.f32 %v1076_v16  ;;  %v2108_v22 = vpop.eup %2107 }
 0x493   : > { %1232 = vmatprep.subr.bf16.mxu1 %v1217_v6  ;;  %v1120_v44 = vmul.f32 %v2108_v22, %v2579_v54  ;;  %v1119_v43 = vmul.f32 %v2108_v22, %v2577_v53 }
 0x494   : > { %1233 = vmatpush1.bf16.msra.mxu1 %v1216_v62  ;;  %v2190_v62 = vmov 1966171168  }
 0x495   : > { %v1162_v51 = vadd.f32 %v1161_v41, %v1120_v44  ;;  %v1141_v57 = vadd.f32 %v1140_v3, %v1119_v43 }
 0x496   : > { %v2110_v40 = vpop.eup %2109 }
 0x497   : > { %v1079_v20 = vpop.xlane.xlu1 %1078  ;;  %v1122_v37 = vmul.f32 %v2110_v40, %v2589_v59  ;;  %v1121_v2 = vmul.f32 %v2110_v40, %v2585_v58 }
 0x498   : > { %2115 = vrcp.f32 %v1079_v20 }
 0x499   : > { %v1082_v5 = vpop.xlane.xlu0 %1081  ;;  %v1219_v45 = vpack.c.bf16 %v1122_v37, %v1120_v44  ;;  %v1218_v46 = vpack.c.bf16 %v1121_v2, %v1119_v43  ;;  %v1163_v53 = vadd.f32 %v1162_v51, %v1122_v37  ;;  %v1142_v58 = vadd.f32 %v1141_v57, %v1121_v2  ;;  %v1131_v2 = vld [vmem:[#allocation4] sm:$0x3]  ;;  %v1201_v51 = vld [vmem:[#allocation3 + $0x18] sm:$0xff] }
 0x49a   : > { %v2112_v7 = vpop.eup %2111  ;;  %2117 = vrcp.f32 %v1082_v5  ;;  %v1199_v5 = vld [vmem:[#allocation3 + $0x8] sm:$0xff] }
 0x49b   : > { %v651_v49 = vpop.permute.xlu1 %650  ;;  %1234 = vmatprep.subr.bf16.mxu1 %v1219_v45  ;;  %v1124_v54 = vmul.f32 %v2112_v7, %v2595_v18  ;;  %v1123_v59 = vmul.f32 %v2112_v7, %v2593_v63 }
 0x49c   : > { %v2114_v8 = vpop.eup %2113  ;;  %1235 = vmatpush1.bf16.msra.mxu1 %v1218_v46  ;;  %v717_v13 = vadd.f32 %v2489_v47, %v651_v49  ;;  %v1200_v46 = vld [vmem:[#allocation3 + $0x10] sm:$0xff] }
 0x49d   : > { %v1126_v25 = vmul.f32 %v2114_v8, %v2601_v35  ;;  %v1125_v11 = vmul.f32 %v2114_v8, %v2597_v15  ;;  %v1164_v56 = vadd.f32 %v1163_v53, %v1124_v54  ;;  %v1143_v0 = vadd.f32 %v1142_v58, %v1123_v59  ;;  %v1202_v58 = vld [vmem:[#allocation3 + $0x20] sm:$0xff] }
 0x49f   : > { %v656_v52 = vpop.permute.xlu1 %655  ;;  %v1221_v55 = vpack.c.bf16 %v1126_v25, %v1124_v54  ;;  %v1220_v4 = vpack.c.bf16 %v1125_v11, %v1123_v59  ;;  %v1165_v15 = vadd.f32 %v1164_v56, %v1126_v25  ;;  %v1144_v28 = vadd.f32 %v1143_v0, %v1125_v11  ;;  %v1203_v25 = vld [vmem:[#allocation3 + $0x28] sm:$0xff]  ;;  %v1205_v0 = vld [vmem:[#allocation3 + $0x38] sm:$0xff] }
 0x4a0   : > { %v720_v10 = vadd.f32 %v2626_v42, %v656_v52  ;;  %v1204_v52 = vld [vmem:[#allocation3 + $0x30] sm:$0xff] }
 0x4a1   : > { %1236 = vmatprep.subr.bf16.mxu1 %v1221_v55  ;;  %v646_v18 = vpop.permute.xlu0 %645 }
 0x4a2   : > { %v2116_v63 = vpop.eup %2115  ;;  %v1207_v60 = vpack.c.bf16 %v720_v10, %v717_v13  ;;  %v712_v35 = vadd.f32 %v2628_v21, %v646_v18  ;;  %1237 = vmatpush1.bf16.msra.mxu1 %v1220_v4 }
 0x4a3   : > { %v1128_v12 = vmul.f32 %v2116_v63, %v2607_v1  ;;  %v1127_v14 = vmul.f32 %v2116_v63, %v2605_v24  ;;  %v1178_v24 = vunpack.c.l.s4 %v2190_v62  ;;  %v2121_v62 = vld [vmem:[%s2848_s3 + $0x8] sm:$0xff] (!%p1907_p12)  }
 0x4a4   : > { %v2118_v17 = vpop.eup %2117  ;;  %v1206_v47 = vpack.c.bf16 %v712_v35, %v709_v61  ;;  %v2675_v61 = vld [vmem:[%s2320_s14 + $0x8] sm:$0xff] (!%p1907_p12)  ;;  %v2681_v35 = vld [vmem:[%s2320_s14] sm:$0xff] (!%p1907_p12) }
 0x4a5   : > { %v1130_v42 = vmul.f32 %v2118_v17, %v2613_v19  ;;  %v1166_v26 = vadd.f32 %v1165_v15, %v1128_v12  ;;  %v1129_v9 = vmul.f32 %v2118_v17, %v2609_v30  ;;  %v1145_v27 = vadd.f32 %v1144_v28, %v1127_v14  ;;  %v2686_v28 = vld [vmem:[%s2320_s14 + $0x10] sm:$0xff] (!%p1907_p12) }
 0x4a6   : > { %v1179_v34 = vunpack.c.0.s8 %v1178_v24  ;;  %v2191_v17 = vmov (!%p1907_p12), 0   ;;  %v2122_v24 = vld [vmem:[%s2848_s3] sm:$0xff] (!%p1907_p12)  }
 0x4a7   : > { %v1167_v29 = vadd.f32 %v1166_v26, %v1130_v42  ;;  %v1223_v48 = vpack.c.bf16 %v1130_v42, %v1128_v12  ;;  %v1146_v23 = vadd.f32 %v1145_v27, %v1129_v9  ;;  %v1222_v31 = vpack.c.bf16 %v1129_v9, %v1127_v14  ;;  %v2689_v12 = vld [vmem:[%s2320_s14 + $0x28] sm:$0xff] (!%p1907_p12)  ;;  %v2692_v14 = vld [vmem:[%s2320_s14 + $0x38] sm:$0xff] (!%p1907_p12)  ;;  %v2704_v27 = vld [vmem:[%s2320_s14 + $0x20] sm:$0xff] (!%p1907_p12)  ;;  %1385 = vmatprep.mubr.bf16.mxu0 (!%p1907_p12), %v2191_v17 }
 0x4a8   : > { %v1182_v44 = vsub.s32 %v1179_v34, %v2670_v38  ;;  %v1305_v26 = vpack.c.bf16 (!%p1907_p12), %v2686_v28, %v2681_v35  ;;  %v1308_v9 = vpack.c.bf16 (!%p1907_p12), %v2692_v14, %v2689_v12  ;;  %2120 = vset.pattern.permute.xlu1 (!%p1907_p12), %v2191_v17  ;;  %2119 = vset.pattern.permute.xlu0 (!%p1907_p12), %v2191_v17  ;;  %v1453_v34 = vld [vmem:[%s2851_s6 + $0x8] sm:$0xff] (!%p1907_p12) }
 0x4a9   : > { %v1168_v21 = vrot.slane %v1167_v29, 4  ;;  %1238 = vmatprep.subr.bf16.mxu1 %v1223_v48  ;;  %v1147_v16 = vrot.slane %v1146_v23, 4  ;;  %v1440_v48 = vmul.f32 (!%p1907_p12), %v2681_v35, %v2681_v35  ;;  %1319 = vperm.xlu0 (!%p1907_p12), %2119, %v1313_v32  }
 0x4aa   : > { %1239 = vmatpush1.bf16.msra.mxu1 %v1222_v31 }
 0x4ab   : > { %v1169_v6 = vadd.f32 %v1168_v21, %v1167_v29  ;;  %v1148_v1 = vadd.f32 %v1147_v16, %v1146_v23  ;;  %v2707_v29 = vld [vmem:[%s2320_s14 + $0x30] sm:$0xff] (!%p1907_p12)  ;;  %v1442_v23 = vmul.f32 (!%p1907_p12), %v2686_v28, %v2686_v28  ;;  %v1445_v16 = vmul.f32 (!%p1907_p12), %v2689_v12, %v2689_v12 }
 0x4ac   : > { %v1307_v31 = vpack.c.bf16 (!%p1907_p12), %v2707_v29, %v2704_v27 }
 0x4ad   : > { %v1170_v33 = vrot.slane %v1169_v6, 2  ;;  %v1149_v22 = vrot.slane %v1148_v1, 2  ;;  %1257 = vmatmul.mubr.bf16.vlgmr.msra.gmra.mrb[8].mxu1 %v1206_v47  ;;  %v1441_v47 = vmul.f32 (!%p1907_p12), %v2675_v61, %v2675_v61 }
 0x4ae   : > { %1266 = vmatprep.mubr.bf16.mxu1 %v2189_v36  ;;  %v1198_v36 = vld [vmem:[#allocation3] sm:$0xff] }
 0x4af   : > { %v1171_v30 = vadd.f32 %v1170_v33, %v1169_v6  ;;  %v1150_v19 = vadd.f32 %v1149_v22, %v1148_v1  ;;  %v1447_v6 = vmul.f32 (!%p1907_p12), %v2692_v14, %v2692_v14  ;;  %v1452_v1 = vld [vmem:[%s2851_s6] sm:$0xff] (!%p1907_p12)  ;;  %v1444_v33 = vmul.f32 (!%p1907_p12), %v2704_v27, %v2704_v27 }
 0x4b0   : > { %1458 = vperm.xlu1 (!%p1907_p12), %2120, %v1452_v1   ;;  %v1446_v22 = vmul.f32 (!%p1907_p12), %v2707_v29, %v2707_v29 }
 0x4b1   : > { %v1172_v40 = vrot.slane %v1171_v30, 1  ;;  %v1151_v50 = vrot.slane %v1150_v19, 1 }
 0x4b3   : > { %v1173_v39 = vadd.f32 %v1172_v40, %v1171_v30  ;;  %v1152_v20 = vadd.f32 %v1151_v50, %v1150_v19  ;;  %v1448_v30 = vpack.c.bf16 (!%p1907_p12), %v1442_v23, %v1440_v48  ;;  %v1451_v19 = vpack.c.bf16 (!%p1907_p12), %v1447_v6, %v1445_v16  ;;  %v1314_v40 = vld [vmem:[%s2849_s4 + $0x8] sm:$0xff] (!%p1907_p12) }
 0x4b4   : > { %v1450_v50 = vpack.c.bf16 (!%p1907_p12), %v1446_v22, %v1444_v33  ;;  %1463 = vperm.xlu1 (!%p1907_p12), %2120, %v1453_v34   ;;  %1324 = vperm.xlu0 (!%p1907_p12), %2119, %v1314_v40  }
 0x4b5   : > { %v1176_v37 = vcombine.low %v1152_v20, %v1173_v39  ;;  %1267 = vmatmul.mubr.bf16.gmra.mrb[12].mxu1 %v1207_v60  ;;  %v2678_v60 = vld [vmem:[%s2320_s14 + $0x18] sm:$0xff] (!%p1907_p12)  ;;  %v2123_v20 = vld [vmem:[%s2850_s5] sm:$0xff] (!%p1907_p12)  }
 0x4b6   : > { %v1306_v15 = vpack.c.bf16 (!%p1907_p12), %v2678_v60, %v2675_v61  ;;  %1395 = vmatprep.mubr.bf16.mxu1 (!%p1907_p12), %v2191_v17  ;;  %v1443_v42 = vmul.f32 (!%p1907_p12), %v2678_v60, %v2678_v60  ;;  %v1316_v39 = vld [vmem:[%s2849_s4 + $0x18] sm:$0xff] (!%p1907_p12) }
 0x4b7   : > { %v1183_v43 = vrot.slane %v1176_v37, %v1182_v44  ;;  %v1455_v37 = vld [vmem:[%s2851_s6 + $0x18] sm:$0xff] (!%p1907_p12) }
 0x4b8   : > { %1950 = vmatprep.subr.bf16.mxu1 (!%p1907_p12), %v1306_v15  ;;  %1353 = vmatprep.subr.bf16.mxu0 (!%p1907_p12), %v1306_v15  ;;  %v1449_v21 = vpack.c.bf16 (!%p1907_p12), %v1443_v42, %v1441_v47 }
 0x4b9   : > { %v1190_v41 = vrot.slane %v1183_v43, %v1182_v44  ;;  %1952 = vmatpush1.bf16.msra.mxu1 (!%p1907_p12), %v1305_v26  ;;  %1354 = vmatpush1.bf16.msra.mxu0 (!%p1907_p12), %v1305_v26  ;;  %v1315_v44 = vld [vmem:[%s2849_s4 + $0x10] sm:$0xff] (!%p1907_p12) }
 0x4ba   : > { %1951 = vmatprep.subr.bf16.mxu1 (!%p1907_p12), %v1308_v9  ;;  %1355 = vmatprep.subr.bf16.mxu0 (!%p1907_p12), %v1308_v9  ;;  %v1454_v43 = vld [vmem:[%s2851_s6 + $0x10] sm:$0xff] (!%p1907_p12) }
 0x4bb   : > { %v1192_v3 = vadd.f32 %v1190_v41, %v1131_v2  ;;  %1334 = vperm.xlu1 (!%p1907_p12), %2120, %v1316_v39   ;;  %1329 = vperm.xlu0 (!%p1907_p12), %2119, %v1315_v44   ;;  %v1578_v2 = vld [vmem:[%s2853_s8 + $0x8] sm:$0xff] (!%p1907_p12) }
 0x4bc   : > { %v2124_v41 = vld [vmem:[%s2850_s5 + $0x8] sm:$0xff] (!%p1907_p12)  }
 0x4bd   : > { %1197 = vst.msk [vmem:[#allocation4] sm:$0x3] %vm1195_vm6, %v1192_v3  ;;  %1953 = vmatpush1.bf16.msra.mxu1 (!%p1907_p12), %v1307_v31  ;;  %1356 = vmatpush1.bf16.msra.mxu0 (!%p1907_p12), %v1307_v31  ;;  %v1577_v3 = vld [vmem:[%s2853_s8] sm:$0xff] (!%p1907_p12) }
 0x4be   : > { %1492 = vmatprep.subr.bf16.mxu1 (!%p1907_p12), %v1449_v21 }
 0x4bf   : > { %1473 = vperm.xlu1 (!%p1907_p12), %2120, %v1455_v37   ;;  %1468 = vperm.xlu0 (!%p1907_p12), %2119, %v1454_v43  }
 0x4c0   : > { %1911 = vmatmul.mubr.msk.bf16.vlgmr.msra.gmra.mrb[0].mxu1 (!%p1907_p12), %vm586_vm3, %v2121_v62  ;;  %1910 = vmatmul.mubr.msk.bf16.vlgmr.msra.gmra.mrb[0].mxu0 (!%p1907_p12), %vm586_vm3, %v2122_v24 }
 0x4c1   : > { %1493 = vmatpush1.bf16.msra.mxu1 (!%p1907_p12), %v1448_v30  ;;  %1524 = vmatprep.mubr.bf16.mxu1 (!%p1907_p12), %v2191_v17 }
 0x4c2   : > { %1494 = vmatprep.subr.bf16.mxu1 (!%p1907_p12), %v1451_v19  ;;  %1649 = vmatprep.mubr.bf16.mxu0 (!%p1907_p12), %v2191_v17 }
 0x4c3   : > { %1588 = vperm.xlu1 (!%p1907_p12), %2120, %v1578_v2   ;;  %1583 = vperm.xlu0 (!%p1907_p12), %2119, %v1577_v3  }
 0x4c5   : > { %1495 = vmatpush1.bf16.msra.mxu1 (!%p1907_p12), %v1450_v50 }
 0x4c8   : > { %1914 = vmatmul.mubr.msk.bf16.vlgmr.msra.gmra.mrb[4].mxu1 (!%p1907_p12), %vm586_vm3, %v2123_v20 }
 0x4c9   : > { %1534 = vmatprep.mubr.bf16.mxu1 (!%p1907_p12), %v2191_v17 }
 0x580   : > { %v1258_v45 = vpop.f32.mrb[8].mxu1 }
 0x581   : > { %v1277_v7 = vadd.f32 %v1258_v45, %v1198_v36  ;;  %v1260_v49 = vpop.f32.mrb[9].mxu1  ;;  %v1580_v36 = vld [vmem:[%s2853_s8 + $0x18] sm:$0xff] (!%p1907_p12)  ;;  %v1414_v45 = vld [vmem:[#allocation4] sm:$0x3] (!%p1907_p12) }
 0x582   : > { %v1278_v57 = vadd.f32 %v1260_v49, %v1199_v5  ;;  %v1262_v54 = vpop.f32.mrb[10].mxu1  ;;  %v1579_v5 = vld [vmem:[%s2853_s8 + $0x10] sm:$0xff] (!%p1907_p12)  ;;  %1598 = vperm.xlu1 (!%p1907_p12), %2120, %v1580_v36   ;;  %v1459_v49 = vpop.permute.xlu1 (!%p1907_p12), %1458 }
 0x583   : > { %1285 = vst [vmem:[#allocation3] sm:$0xff] %v1277_v7  ;;  %v1279_v59 = vadd.f32 %v1262_v54, %v1200_v46  ;;  %v1264_v8 = vpop.f32.mrb[11].mxu1  ;;  %1915 = vmatmul.mubr.msk.bf16.gmra.mrb[8].mxu1 (!%p1907_p12), %vm586_vm3, %v2124_v41  ;;  %1593 = vperm.xlu0 (!%p1907_p12), %2119, %v1579_v5   ;;  %v1415_v46 = vadd.f32 (!%p1907_p12), 1e-09, %v1414_v45  ;;  %v1320_v7 = vpop.permute.xlu0 (!%p1907_p12), %1319 }
 0x584   : > { %1286 = vst [vmem:[#allocation3 + $0x8] sm:$0xff] %v1278_v57  ;;  %v1280_v53 = vadd.f32 %v1264_v8, %v1201_v51  ;;  %v1420_v8 = vsub.s32 (!%p1907_p12), 0, %v2670_v38 }
 0x585   : > { %1287 = vst [vmem:[#allocation3 + $0x10] sm:$0xff] %v1279_v59  ;;  %2127 = vrcp.f32 (!%p1907_p12), %v1415_v46 }
 0x586   : > { %1288 = vst [vmem:[#allocation3 + $0x18] sm:$0xff] %v1280_v53 }
 0x588   : > { %v1268_v11 = vpop.f32.mrb[12].mxu1  ;;  %1296 = sbr.rel (%p1907_p12) target bundleno = 2016 (0x7e0), region = 102 }
 0x589   : > { %v1281_v56 = vadd.f32 %v1268_v11, %v1202_v58  ;;  %v1270_v55 = vpop.f32.mrb[13].mxu1  ;;  %v1424_v11 = vsub.s32 (!%p1907_p12), 1, %v2670_v38 }
 0x58a   : > { %v1282_v4 = vadd.f32 %v1270_v55, %v1203_v25  ;;  %v1272_v13 = vpop.f32.mrb[14].mxu1  ;;  %v1325_v55 = vpop.permute.xlu0 (!%p1907_p12), %1324 }
 0x58b   : > { %1289 = vst [vmem:[#allocation3 + $0x20] sm:$0xff] %v1281_v56  ;;  %v1283_v10 = vadd.f32 %v1272_v13, %v1204_v52  ;;  %v1274_v18 = vpop.f32.mrb[15].mxu1  ;;  %v1406_v13 = vld [vmem:[#allocation3] sm:$0xff] (!%p1907_p12) }
 0x58c   : > { %1290 = vst [vmem:[#allocation3 + $0x28] sm:$0xff] %v1282_v4  ;;  %v1284_v63 = vadd.f32 %v1274_v18, %v1205_v0  ;;  %v1464_v4 = vpop.permute.xlu1 (!%p1907_p12), %1463  ;;  %v1408_v47 = vld [vmem:[#allocation3 + $0x10] sm:$0xff] (!%p1907_p12) }
 0x58d   : > { %1291 = vst [vmem:[#allocation3 + $0x30] sm:$0xff] %v1283_v10  ;;  %v1409_v48 = vld [vmem:[#allocation3 + $0x18] sm:$0xff] (!%p1907_p12) }
 0x58e   : > { %1292 = vst [vmem:[#allocation3 + $0x38] sm:$0xff] %v1284_v63  ;;  %v1407_v63 = vld [vmem:[#allocation3 + $0x8] sm:$0xff] (!%p1907_p12)  ;;  %v1330_v23 = vpop.permute.xlu0 (!%p1907_p12), %1329 }
 0x58f   : > { %v2128_v53 = vpop.eup %2127 }
 0x590   : > { %v1421_v0 = vrot.slane %v2128_v53, %v1420_v8  ;;  %v1425_v10 = vrot.slane %v2128_v53, %v1424_v11  ;;  %v1335_v33 = vpop.permute.xlu1 %1334 }
 0x592   : > { %v1428_v42 = vmul.f32 %v1421_v0, %v1406_v13  ;;  %v1429_v21 = vmul.f32 %v1425_v10, %v1407_v63  ;;  %v1430_v62 = vmul.f32 %v1421_v0, %v1408_v47  ;;  %v1431_v19 = vmul.f32 %v1425_v10, %v1409_v48  ;;  %v1410_v40 = vld [vmem:[#allocation3 + $0x20] sm:$0xff]  ;;  %v1469_v36 = vpop.permute.xlu0 %1468 }
 0x593   : > { %v1397_v51 = vpop.f32.mrb[0].mxu1  ;;  %v1387_v57 = vpop.f32.mrb[0].mxu0  ;;  %v1411_v20 = vld [vmem:[#allocation3 + $0x28] sm:$0xff]  ;;  %v1432_v3 = vmul.f32 %v1421_v0, %v1410_v40 }
 0x594   : > { %v1399_v54 = vpop.f32.mrb[1].mxu1  ;;  %v1389_v59 = vpop.f32.mrb[1].mxu0  ;;  %v1388_v18 = vadd.f32 %v1387_v57, %v1320_v7  ;;  %v1412_v44 = vld [vmem:[#allocation3 + $0x30] sm:$0xff]  ;;  %v1433_v46 = vmul.f32 %v1425_v10, %v1411_v20  ;;  %v1398_v57 = vadd.f32 %v1397_v51, %v1330_v23 }
 0x595   : > { %v1401_v58 = vpop.f32.mrb[2].mxu1  ;;  %v1391_v25 = vpop.f32.mrb[2].mxu0  ;;  %v1390_v31 = vadd.f32 %v1389_v59, %v1320_v7  ;;  %v1413_v37 = vld [vmem:[#allocation3 + $0x38] sm:$0xff]  ;;  %v1434_v7 = vmul.f32 %v1421_v0, %v1412_v44 }
 0x596   : > { %v1403_v52 = vpop.f32.mrb[3].mxu1  ;;  %v1393_v56 = vpop.f32.mrb[3].mxu0  ;;  %v1392_v6 = vadd.f32 %v1391_v25, %v1325_v55  ;;  %v1402_v63 = vadd.f32 %v1401_v58, %v1335_v33 }
 0x597   : > { %v1394_v22 = vadd.f32 %v1393_v56, %v1325_v55  ;;  %v1474_v11 = vpop.permute.xlu1 %1473  ;;  %v1400_v56 = vadd.f32 %v1399_v54, %v1330_v23  ;;  %v1404_v51 = vadd.f32 %v1403_v52, %v1335_v33 }
 0x59b   : > { %v1526_v15 = vpop.f32.mrb[4].mxu1 }
 0x59c   : > { %v1527_v26 = vadd.f32 %v1526_v15, %v1459_v49  ;;  %v1528_v9 = vpop.f32.mrb[5].mxu1 }
 0x59d   : > { %v1529_v16 = vadd.f32 %v1528_v9, %v1459_v49  ;;  %v1530_v38 = vpop.f32.mrb[6].mxu1  ;;  %v1435_v49 = vmul.f32 %v1425_v10, %v1413_v37 }
 0x59e   : > { %v1545_v1 = vmul.f32 %v1527_v26, %v1388_v18  ;;  %v1531_v24 = vadd.f32 %v1530_v38, %v1464_v4  ;;  %v1532_v32 = vpop.f32.mrb[7].mxu1  ;;  %v2125_v38 = vld [vmem:[%s2867_s27] sm:$0xff]  }
 0x59f   : > { %v1546_v30 = vmul.f32 %v1529_v16, %v1390_v31  ;;  %v1533_v34 = vadd.f32 %v1532_v32, %v1464_v4 }
 0x5a0   : > { %v1553_v50 = vadd.f32 %v1545_v1, %v1428_v42  ;;  %v1547_v39 = vmul.f32 %v1531_v24, %v1392_v6  ;;  %v1589_v1 = vpop.permute.xlu1 %1588 }
 0x5a1   : > { %v1554_v43 = vadd.f32 %v1546_v30, %v1429_v21  ;;  %v1548_v2 = vmul.f32 %v1533_v34, %v1394_v22 }
 0x5a2   : > { %v1555_v41 = vadd.f32 %v1547_v39, %v1430_v62  ;;  %v1565_v59 = vsub.f32 %v2681_v35, %v1553_v50 }
 0x5a3   : > { %v1556_v5 = vadd.f32 %v1548_v2, %v1431_v19  ;;  %v1566_v13 = vsub.f32 %v2675_v61, %v1554_v43 }
 0x5a4   : > { %v1567_v8 = vsub.f32 %v2686_v28, %v1555_v41 }
 0x5a5   : > { %v1568_v18 = vsub.f32 %v2678_v60, %v1556_v5 }
 0x5a6   : > { %v1573_v10 = vpack.c.bf16 %v1567_v8, %v1565_v59 }
 0x5a7   : > { %v1574_v26 = vpack.c.bf16 %v1568_v18, %v1566_v13 }
 0x5a9   : > { %1617 = vmatprep.subr.bf16.mxu0 %v1574_v26 }
 0x5aa   : > { %1618 = vmatpush1.bf16.msra.mxu0 %v1573_v10 }
 0x601   : > { %v1599_v41 = vpop.permute.xlu1 %1598 }
 0x656   : > { %v1536_v45 = vpop.f32.mrb[8].mxu1 }
 0x657   : > { %v1537_v53 = vadd.f32 %v1536_v45, %v1469_v36  ;;  %v1538_v25 = vpop.f32.mrb[9].mxu1 }
 0x658   : > { %v1539_v55 = vadd.f32 %v1538_v25, %v1469_v36  ;;  %v1540_v4 = vpop.f32.mrb[10].mxu1 }
 0x659   : > { %v1549_v15 = vmul.f32 %v1537_v53, %v1398_v57  ;;  %v1541_v47 = vadd.f32 %v1540_v4, %v1474_v11  ;;  %v1542_v0 = vpop.f32.mrb[11].mxu1 }
 0x65a   : > { %v1550_v42 = vmul.f32 %v1539_v55, %v1400_v56  ;;  %v1543_v35 = vadd.f32 %v1542_v0, %v1474_v11 }
 0x65b   : > { %v1557_v28 = vadd.f32 %v1549_v15, %v1432_v3  ;;  %v1551_v9 = vmul.f32 %v1541_v47, %v1402_v63 }
 0x65c   : > { %v1558_v48 = vadd.f32 %v1550_v42, %v1433_v46  ;;  %v1552_v31 = vmul.f32 %v1543_v35, %v1404_v51 }
 0x65d   : > { %v1559_v54 = vadd.f32 %v1551_v9, %v1434_v7  ;;  %v1569_v61 = vsub.f32 %v2704_v27, %v1557_v28 }
 0x65e   : > { %v1560_v23 = vadd.f32 %v1552_v31, %v1435_v49  ;;  %v1570_v58 = vsub.f32 %v2689_v12, %v1558_v48  ;;  %v2126_v12 = vld [vmem:[%s2867_s27 + $0x8] sm:$0xff]  }
 0x65f   : > { %v1571_v60 = vsub.f32 %v2707_v29, %v1559_v54 }
 0x660   : > { %v1572_v21 = vsub.f32 %v2692_v14, %v1560_v23  ;;  %v1584_v14 = vpop.permute.xlu0 %1583 }
 0x661   : > { %v1575_v52 = vpack.c.bf16 %v1571_v60, %v1569_v61 }
 0x662   : > { %v1576_v16 = vpack.c.bf16 %v1572_v21, %v1570_v58 }
 0x664   : > { %1619 = vmatprep.subr.bf16.mxu0 %v1576_v16  ;;  %v1594_v20 = vpop.permute.xlu0 %1593 }
 0x665   : > { %1620 = vmatpush1.bf16.msra.mxu0 %v1575_v52 }
 0x668   : > { %1918 = vmatmul.mubr.msk.bf16.vlgmr.msra.gmra.mrb[4].mxu0 %vm586_vm3, %v2125_v38 }
 0x669   : > { %1659 = vmatprep.mubr.bf16.mxu0 %v2191_v17 }
 0x670   : > { %1919 = vmatmul.mubr.msk.bf16.gmra.mrb[8].mxu0 %vm586_vm3, %v2126_v12 }
 0x73b   : > { %v1651_v27 = vpop.f32.mrb[4].mxu0 }
 0x73c   : > { %v1652_v29 = vadd.f32 %v1651_v27, %v1584_v14  ;;  %v1653_v6 = vpop.f32.mrb[5].mxu0 }
 0x73d   : > { %v1654_v62 = vadd.f32 %v1653_v6, %v1584_v14  ;;  %v1655_v24 = vpop.f32.mrb[6].mxu0 }
 0x73e   : > { %1670 = vst [vmem:[%s2325_s26] sm:$0xff] %v1652_v29  ;;  %v1656_v32 = vadd.f32 %v1655_v24, %v1589_v1  ;;  %v1657_v33 = vpop.f32.mrb[7].mxu0  ;;  %v1695_v22 = vmul.f32 %v1652_v29, %v1652_v29 }
 0x73f   : > { %1671 = vst [vmem:[%s2325_s26 + $0x8] sm:$0xff] %v1654_v62  ;;  %v1658_v17 = vadd.f32 %v1657_v33, %v1589_v1  ;;  %v1678_v30 = vadd.f32 %v1654_v62, %v1652_v29  ;;  %v1696_v19 = vmul.f32 %v1654_v62, %v1654_v62 }
 0x740   : > { %1672 = vst [vmem:[%s2325_s26 + $0x10] sm:$0xff] %v1656_v32  ;;  %v1697_v34 = vmul.f32 %v1656_v32, %v1656_v32 }
 0x741   : > { %1673 = vst [vmem:[%s2325_s26 + $0x18] sm:$0xff] %v1658_v17  ;;  %1679 = vadd.xlane.f32.xlu0 %v1678_v30  ;;  %v1681_v40 = vadd.f32 %v1658_v17, %v1656_v32  ;;  %v1698_v50 = vmul.f32 %v1658_v17, %v1658_v17  ;;  %v1703_v39 = vadd.f32 %v1696_v19, %v1695_v22 }
 0x743   : > { %v1661_v44 = vpop.f32.mrb[8].mxu0  ;;  %1682 = vadd.xlane.f32.xlu1 %v1681_v40  ;;  %v1706_v37 = vadd.f32 %v1698_v50, %v1697_v34 }
 0x744   : > { %v1662_v43 = vadd.f32 %v1661_v44, %v1594_v20  ;;  %v1663_v2 = vpop.f32.mrb[9].mxu0 }
 0x745   : > { %v1664_v3 = vadd.f32 %v1663_v2, %v1594_v20  ;;  %v1665_v36 = vpop.f32.mrb[10].mxu0  ;;  %1707 = vadd.xlane.f32.xlu0 %v1706_v37 }
 0x746   : > { %1674 = vst [vmem:[%s2325_s26 + $0x20] sm:$0xff] %v1662_v43  ;;  %v1666_v5 = vadd.f32 %v1665_v36, %v1599_v41  ;;  %v1667_v45 = vpop.f32.mrb[11].mxu0  ;;  %v1699_v46 = vmul.f32 %v1662_v43, %v1662_v43 }
 0x747   : > { %1675 = vst [vmem:[%s2325_s26 + $0x28] sm:$0xff] %v1664_v3  ;;  %v1668_v7 = vadd.f32 %v1667_v45, %v1599_v41  ;;  %1704 = vadd.xlane.f32.xlu1 %v1703_v39  ;;  %v1684_v49 = vadd.f32 %v1664_v3, %v1662_v43  ;;  %v1700_v57 = vmul.f32 %v1664_v3, %v1664_v3 }
 0x748   : > { %1676 = vst [vmem:[%s2325_s26 + $0x30] sm:$0xff] %v1666_v5  ;;  %v1701_v59 = vmul.f32 %v1666_v5, %v1666_v5 }
 0x749   : > { %1677 = vst [vmem:[%s2325_s26 + $0x38] sm:$0xff] %v1668_v7  ;;  %1685 = vadd.xlane.f32.xlu0 %v1684_v49  ;;  %v1709_v8 = vadd.f32 %v1700_v57, %v1699_v46  ;;  %v1687_v53 = vadd.f32 %v1668_v7, %v1666_v5  ;;  %v1702_v25 = vmul.f32 %v1668_v7, %v1668_v7 }
 0x74b   : > { %1710 = vadd.xlane.f32.xlu1 %v1709_v8  ;;  %v1712_v11 = vadd.f32 %v1702_v25, %v1701_v59 }
 0x74d   : > { %1688 = vadd.xlane.f32.xlu0 %v1687_v53 }
 0x751   : > { %1713 = vadd.xlane.f32.xlu0 %v1712_v11 }
 0x7ce   : > { %v1680_v56 = vpop.xlane.xlu0 %1679 }
 0x7cf   : > { %1691 = vst.msk [vmem:[%s2330_s25] sm:$0xff] %vm1690_vm7, %v1680_v56 }
 0x7d0   : > { %v1683_v55 = vpop.xlane.xlu1 %1682 }
 0x7d1   : > { %1692 = vst.msk [vmem:[%s2330_s25 + $0x8] sm:$0xff] %vm1690_vm7, %v1683_v55 }
 0x7d2   : > { %v1708_v4 = vpop.xlane.xlu0 %1707 }
 0x7d3   : > { %1716 = vst.msk [vmem:[%s2335_s22 + $0x8] sm:$0xff] %vm1690_vm7, %v1708_v4 }
 0x7d4   : > { %v1705_v13 = vpop.xlane.xlu1 %1704 }
 0x7d5   : > { %1715 = vst.msk [vmem:[%s2335_s22] sm:$0xff] %vm1690_vm7, %v1705_v13 }
 0x7d6   : > { %v1686_v18 = vpop.xlane.xlu0 %1685 }
 0x7d7   : > { %1693 = vst.msk [vmem:[%s2330_s25 + $0x10] sm:$0xff] %vm1690_vm7, %v1686_v18 }
 0x7d8   : > { %v1711_v63 = vpop.xlane.xlu1 %1710 }
 0x7d9   : > { %1717 = vst.msk [vmem:[%s2335_s22 + $0x10] sm:$0xff] %vm1690_vm7, %v1711_v63 }
 0x7da   : > { %v1689_v15 = vpop.xlane.xlu0 %1688 }
 0x7db   : > { %1694 = vst.msk [vmem:[%s2330_s25 + $0x18] sm:$0xff] %vm1690_vm7, %v1689_v15 }
 0x7de   : > { %v1714_v47 = vpop.xlane.xlu0 %1713 }
 0x7df   : > { %1718 = vst.msk [vmem:[%s2335_s22 + $0x18] sm:$0xff] %vm1690_vm7, %v1714_v47 }
 0x7e0 PF: > { %s22_s23 = sadd.s32 1, %s2183_s23   ;;  %s2868_s20 = sld [smem:[#allocation6_spill]] }
 0x7e1   : > { %p19_p13 = scmp.ge.s32.totalorder %s22_s23, 6   ;;  %s2869_s26 = sld [smem:[#allocation7_spill]] }
 0x7e2   : > { %s2870_s22 = sld [smem:[#allocation8_spill]]  ;;  %s2871_s17 = smov %s2163_s18 }
 0x7e3   : > { %s2872_s18 = smov %s2303_s30  ;;  %s2873_s19 = smov %s2175_s21 }
 0x7e4   :  { %21 = sbr.rel (!%p19_p13) target bundleno = 7 (0x7), region = 164 }
 0x7e7   : > { %s2874_s21 = smov %s2869_s26 }

</bundles_post_ra>
